<compile_context>
chip_gen: v7x
topology: tpu7x:2x2x1
jax: 0.10.0
libtpu: 0.0.40
codegen_flags: <defaults>
</compile_context>

<pallas_src>
import functools

import jax
import jax.numpy as jnp
from jax.experimental import pallas as pl
from jax.experimental.pallas import tpu as pltpu

LEAK = 0.2
BN_EPS = 1e-5


def _vmem_limit_bytes():
    """Per-generation scoped-VMEM cap (review: budget from the chip, not a constant)."""
    try:
        cap = int(pltpu.get_tpu_info().vmem_capacity_bytes)
    except Exception:
        return 48 * 1024 * 1024            # conservative fallback, safe on v7x too
    # leave >=32 MiB headroom for compiler-internal scratch / pipelining buffers
    return int(min(max(cap - 32 * 1024 * 1024, 32 * 1024 * 1024), 96 * 1024 * 1024))


VMEM_LIMIT = _vmem_limit_bytes()


def _largest_divisor_leq(n, cap):
    cap = int(max(1, min(n, cap)))
    for d in range(cap, 0, -1):
        if n % d == 0:
            return d
    return 1


# ----------------------------- Pallas kernels ------------------------------ #

def _convT_stats_kernel(xpf_ref, w_ref, edge_ref, y_ref, s0_ref, s1_ref,
                        *, bn, nout, hw, wdim):
    """ConvTranspose2d(4,2,1) for `bn` images (all 4 output parities) + BN partial sums.

    xpf_ref : (bn, nin, HW + 2*(W+1)) bf16  flattened spatial, one-row halo pad
    w_ref   : (4, 4, nout, nin)       bf16  per-(parity, tap) weight, already transposed
    edge_ref: (2, HW)                 bf16  col masks (row0: jx==0 -> 0, row1: jx==W-1 -> 0)
    y_ref   : (bn, 4, nout, HW)       bf16  conv output (channels on sublanes, HW on lanes)
    s0_ref  : (1, nout, 1)            f32   partial sum   of this step's outputs
    s1_ref  : (1, nout, 1)            f32   partial sumsq of this step's outputs

    The ConvTranspose bias is intentionally NOT added: in front of a training-mode
    BatchNorm it only shifts the batch mean, which is subtracted again.
    """
    mask_m = edge_ref[0:1, :]            # zeroes jx == 0     (dx = -1 taps)
    mask_p = edge_ref[1:2, :]            # zeroes jx == W-1   (dx = +1 taps)
    s0 = jnp.zeros((nout, 1), jnp.float32)
    s1 = jnp.zeros((nout, 1), jnp.float32)
    for b in range(bn):                  # static unroll over images in this step
        xb = xpf_ref[b]                  # (nin, HWp)
        for p in range(4):               # static unroll over the 4 output parities
            py, px = p // 2, p % 2
            dy1, dx1 = 2 * py - 1, 2 * px - 1
            acc = jnp.zeros((nout, hw), jnp.float32)
            for t in range(4):           # static unroll over the 4 contributing taps
                ty, tx = t // 2, t % 2
                dy = dy1 if ty else 0
                dx = dx1 if tx else 0
                start = (wdim + 1) + dy * wdim + dx          # static lane offset
                xs = xb[:, start:start + hw]                  # (nin, HW) shifted view
                if dx == -1:
                    xs = xs * mask_m
                elif dx == 1:
                    xs = xs * mask_p
                # MXU: (nout, nin) @ (nin, HW) -> lane-dense (nout, HW), f32 accumulate
                acc = acc + jnp.dot(w_ref[p, t], xs,
                                    preferred_element_type=jnp.float32)
            y_ref[b, p] = acc.astype(y_ref.dtype)
            s0 = s0 + jnp.sum(acc, axis=1, keepdims=True)
            s1 = s1 + jnp.sum(acc * acc, axis=1, keepdims=True)
    s0_ref[0] = s0
    s1_ref[0] = s1


def _bn_lrelu_kernel(y_ref, scale_ref, shift_ref, o_ref):
    """Fused BatchNorm affine (precomputed per-channel scale/shift) + LeakyReLU(0.2)."""
    z = y_ref[...].astype(jnp.float32) * scale_ref[...] + shift_ref[...]
    o_ref[...] = jnp.where(z >= 0, z, LEAK * z).astype(o_ref.dtype)


# ------------------------------- glue (JAX) -------------------------------- #

@jax.jit
def dcgan_upconv_forward(x, weight, bias, gamma, beta):
    """ConvTranspose2d(nin,nout,4,2,1) -> BatchNorm2d (batch stats) -> LeakyReLU(0.2).

    x: (N, nin, H, W) NCHW float32; returns (N, nout, 2H, 2W) NCHW float32.
    """
    del bias                                  # absorbed by training-mode BatchNorm
    N, C, H, W = x.shape
    nout = weight.shape[1]
    HW = H * W
    HWP = HW + 2 * (W + 1)

    # Raw input, flattened spatial with a one-row halo pad: ~1x the input in HBM,
    # instead of the previous 16x im2col expansion.
    xpf = jnp.pad(x.astype(jnp.bfloat16).reshape(N, C, HW),
                  ((0, 0), (0, 0), (W + 1, W + 1)))

    # Per-(parity, tap) weight matrices, transposed for (nout, nin) @ (nin, HW).
    # Kernel tap index per (parity_bit, tap_bit):  dy=0 -> kh=py+1,  dy=+-1 -> kh=3*(1-py).
    wt = jnp.transpose(weight, (1, 0, 2, 3)).astype(jnp.bfloat16)   # (nout, nin, 4, 4)
    tap_k = ((1, 3), (2, 0))
    w4 = jnp.stack([
        jnp.stack([wt[:, :, tap_k[py][ty], tap_k[px][tx]]
                   for ty in (0, 1) for tx in (0, 1)], axis=0)
        for py in (0, 1) for px in (0, 1)], axis=0)                  # (4, 4, nout, nin)

    # Column-edge masks for the dx = -1 / +1 taps (row wrap-around in the flat layout).
    col = jnp.arange(HW, dtype=jnp.int32) % W
    edge = jnp.stack([(col != 0), (col != W - 1)]).astype(jnp.bfloat16)   # (2, HW)

    # ---- pass 1: conv-transpose matmuls + BN partial sums ----
    per1 = 4 * (C * HWP + 4 * nout * HW)          # ~bytes/image in VMEM (double-buffered)
    bn1 = _largest_divisor_leq(N, min(8, max(1, (8 << 20) // max(per1, 1))))
    g1 = N // bn1
    y, s0, s1 = pl.pallas_call(
        functools.partial(_convT_stats_kernel, bn=bn1, nout=nout, hw=HW, wdim=W),
        out_shape=(jax.ShapeDtypeStruct((N, 4, nout, HW), jnp.bfloat16),
                   jax.ShapeDtypeStruct((g1, nout, 1), jnp.float32),
                   jax.ShapeDtypeStruct((g1, nout, 1), jnp.float32)),
        grid=(g1,),
        in_specs=[
            pl.BlockSpec((bn1, C, HWP), lambda i: (i, 0, 0)),
            pl.BlockSpec((4, 4, nout, C), lambda i: (0, 0, 0, 0)),
            pl.BlockSpec((2, HW), lambda i: (0, 0)),
        ],
        out_specs=(
            pl.BlockSpec((bn1, 4, nout, HW), lambda i: (i, 0, 0, 0)),
            pl.BlockSpec((1, nout, 1), lambda i: (i, 0, 0)),
            pl.BlockSpec((1, nout, 1), lambda i: (i, 0, 0)),
        ),
        compiler_params=pltpu.CompilerParams(
            dimension_semantics=("parallel",),    # partial stats => no cross-step dep
            vmem_limit_bytes=VMEM_LIMIT),
    )(xpf, w4, edge)

    # ---- BatchNorm batch statistics (training mode, biased variance) ----
    # NOTE: E[x^2]-E[x]^2 in f32; fine at bf16 tolerance (review correctness note).
    count = jnp.float32(4 * N * HW)               # = N * (2H) * (2W) output pixels
    mean = jnp.sum(s0, axis=(0, 2)) / count
    var = jnp.maximum(jnp.sum(s1, axis=(0, 2)) / count - mean * mean, 0.0)
    scale = (gamma.astype(jnp.float32) / jnp.sqrt(var + BN_EPS)).reshape(nout, 1)
    shift = beta.astype(jnp.float32).reshape(nout, 1) - mean.reshape(nout, 1) * scale
    # TODO(synk): PyTorch BN also updates running_mean/running_var buffers in place;
    # that stateful side effect does not affect the returned output and is omitted.

    # ---- pass 2: fused BN affine + LeakyReLU, lane-dense, aliased in-place over Y ----
    bn2 = _largest_divisor_leq(N, max(1, (16 << 20) // max(32 * nout * HW, 1)))
    z = pl.pallas_call(
        _bn_lrelu_kernel,
        out_shape=jax.ShapeDtypeStruct((N, 4, nout, HW), jnp.bfloat16),
        grid=(N // bn2,),
        in_specs=[
            pl.BlockSpec((bn2, 4, nout, HW), lambda i: (i, 0, 0, 0)),
            pl.BlockSpec((nout, 1), lambda i: (0, 0)),
            pl.BlockSpec((nout, 1), lambda i: (0, 0)),
        ],
        out_specs=pl.BlockSpec((bn2, 4, nout, HW), lambda i: (i, 0, 0, 0)),
        input_output_aliases={0: 0},              # overwrite Y in place
        compiler_params=pltpu.CompilerParams(
            dimension_semantics=("parallel",),
            vmem_limit_bytes=VMEM_LIMIT),
    )(y, scale, shift)

    # ---- sub-pixel reassembly: z[n, 2*py+px, c, jy*W+jx] -> out[n, c, 2jy+py, 2jx+px]
    # TODO(synk): this parity-interleave transpose (+ f32 cast) is the one remaining
    # XLA epilogue; returning NHWC / bf16 instead of the module's NCHW float32 output
    # would remove it entirely.
    out = z.reshape(N, 2, 2, nout, H, W)
    out = jnp.transpose(out, (0, 3, 4, 1, 5, 2))
    return out.reshape(N, nout, 2 * H, 2 * W).astype(jnp.float32)


# ------------------------- pure-JAX reference check ------------------------ #

def _reference_forward(x, weight, bias, gamma, beta):
    # Transposed conv == lhs-dilated conv with flipped, channel-swapped kernel.
    rhs = jnp.flip(weight, axis=(2, 3))
    rhs = jnp.transpose(rhs, (1, 0, 2, 3))                  # (nout, nin, 4, 4) OIHW
    conv = jax.lax.conv_general_dilated(
        x, rhs, window_strides=(1, 1), padding=[(2, 2), (2, 2)],
        lhs_dilation=(2, 2), rhs_dilation=(1, 1),
        dimension_numbers=("NCHW", "OIHW", "NCHW"))
    conv = conv + bias.reshape(1, -1, 1, 1)
    mean = conv.mean(axis=(0, 2, 3), keepdims=True)
    var = conv.var(axis=(0, 2, 3), keepdims=True)
    yn = (conv - mean) / jnp.sqrt(var + BN_EPS)
    yn = yn * gamma.reshape(1, -1, 1, 1) + beta.reshape(1, -1, 1, 1)
    return jnp.where(yn >= 0, yn, LEAK * yn)


if __name__ == "__main__":
    key = jax.random.PRNGKey(0)
    k1, k2, k3, k4, k5 = jax.random.split(key, 5)
    N, nin, nout, H, W = 2, 4, 8, 16, 16

    x = jax.random.normal(k1, (N, nin, H, W), jnp.float32)
    weight = jax.random.normal(k2, (nin, nout, 4, 4), jnp.float32) * 0.1
    bias = jax.random.normal(k3, (nout,), jnp.float32) * 0.1
    gamma = 1.0 + 0.1 * jax.random.normal(k4, (nout,), jnp.float32)
    beta = 0.1 * jax.random.normal(k5, (nout,), jnp.float32)

    out = dcgan_upconv_forward(x, weight, bias, gamma, beta)
    out = jax.block_until_ready(out)

    assert out.shape == (N, nout, 2 * H, 2 * W), out.shape
    ref = _reference_forward(x, weight, bias, gamma, beta)
    max_err = float(jnp.max(jnp.abs(out - ref)))
    # bf16 matmul inputs + bf16 intermediate -> compare against the f32 reference
    # with bf16-appropriate tolerance.
    assert jnp.allclose(out, ref, rtol=5e-2, atol=5e-2), max_err

    print("KERNEL_OK")
</pallas_src>

<mosaic_0001>
module attributes {stable_mosaic.version = 11 : i64} {
  func.func @_bn_lrelu_kernel(%arg0: i32, %arg1: memref<2x4x8x256xbf16, #tpu.memory_space<vmem>>, %arg2: memref<8x1xf32, #tpu.memory_space<vmem>>, %arg3: memref<8x1xf32, #tpu.memory_space<vmem>>, %arg4: memref<2x4x8x256xbf16, #tpu.memory_space<vmem>>) attributes {dimension_semantics = [#tpu.dimension_semantics<parallel>], iteration_bounds = array<i64: 1>, scalar_prefetch = 0 : i64, scratch_operands = 0 : i64, tpu.core_type = #tpu.core_type<tc>, window_params = [{transform_indices = @transform_0, window_bounds = array<i64: 2, 4, 8, 256>}, {pipeline_mode = #tpu.pipeline_mode<synchronous>, transform_indices = @transform_1, window_bounds = array<i64: 8, 1>}, {pipeline_mode = #tpu.pipeline_mode<synchronous>, transform_indices = @transform_2, window_bounds = array<i64: 8, 1>}, {transform_indices = @transform_3, window_bounds = array<i64: 2, 4, 8, 256>}]} {
    %c0 = arith.constant 0 : index
    %c0_0 = arith.constant 0 : index
    %c0_1 = arith.constant 0 : index
    %c0_2 = arith.constant 0 : index
    %0 = vector.load %arg1[%c0, %c0_0, %c0_1, %c0_2] : memref<2x4x8x256xbf16, #tpu.memory_space<vmem>>, vector<2x4x8x256xbf16>
    %1 = arith.extf %0 : vector<2x4x8x256xbf16> to vector<2x4x8x256xf32>
    %c0_3 = arith.constant 0 : index
    %c0_4 = arith.constant 0 : index
    %2 = vector.load %arg2[%c0_3, %c0_4] : memref<8x1xf32, #tpu.memory_space<vmem>>, vector<8x1xf32>
    %3 = vector.shape_cast %2 : vector<8x1xf32> to vector<1x1x8x1xf32>
    %4 = vector.broadcast %3 : vector<1x1x8x1xf32> to vector<2x4x8x256xf32>
    %5 = arith.mulf %1, %4 : vector<2x4x8x256xf32>
    %c0_5 = arith.constant 0 : index
    %c0_6 = arith.constant 0 : index
    %6 = vector.load %arg3[%c0_5, %c0_6] : memref<8x1xf32, #tpu.memory_space<vmem>>, vector<8x1xf32>
    %7 = vector.shape_cast %6 : vector<8x1xf32> to vector<1x1x8x1xf32>
    %8 = vector.broadcast %7 : vector<1x1x8x1xf32> to vector<2x4x8x256xf32>
    %9 = arith.addf %5, %8 : vector<2x4x8x256xf32>
    %cst = arith.constant 0.000000e+00 : f32
    %10 = vector.broadcast %cst : f32 to vector<2x4x8x256xf32>
    %11 = arith.cmpf oge, %9, %10 : vector<2x4x8x256xf32>
    %cst_7 = arith.constant 2.000000e-01 : f32
    %12 = vector.broadcast %cst_7 : f32 to vector<2x4x8x256xf32>
    %13 = arith.mulf %12, %9 : vector<2x4x8x256xf32>
    %14 = arith.select %11, %9, %13 : vector<2x4x8x256xi1>, vector<2x4x8x256xf32>
    %15 = arith.truncf %14 : vector<2x4x8x256xf32> to vector<2x4x8x256xbf16>
    %c0_8 = arith.constant 0 : index
    %c0_9 = arith.constant 0 : index
    %c0_10 = arith.constant 0 : index
    %c0_11 = arith.constant 0 : index
    %16 = vector.load %arg4[%c0_8, %c0_9, %c0_10, %c0_11] : memref<2x4x8x256xbf16, #tpu.memory_space<vmem>>, vector<2x4x8x256xbf16>
    tpu.vector_store %arg4[%c0_8, %c0_9, %c0_10, %c0_11], %15 {strides = array<i32>} : memref<2x4x8x256xbf16, #tpu.memory_space<vmem>>, vector<2x4x8x256xbf16>,
    return
  }
  func.func @transform_0(%arg0: i32) -> (i32, i32, i32, i32) {
    %c0_i32 = arith.constant 0 : i32
    %c0_i32_0 = arith.constant 0 : i32
    %c0_i32_1 = arith.constant 0 : i32
    %c0_i32_2 = arith.constant 0 : i32
    return %arg0, %c0_i32, %c0_i32_0, %c0_i32_1 : i32, i32, i32, i32
  }
  func.func @transform_1(%arg0: i32) -> (i32, i32) {
    %c0_i32 = arith.constant 0 : i32
    %c0_i32_0 = arith.constant 0 : i32
    %c0_i32_1 = arith.constant 0 : i32
    return %c0_i32, %c0_i32_0 : i32, i32
  }
  func.func @transform_2(%arg0: i32) -> (i32, i32) {
    %c0_i32 = arith.constant 0 : i32
    %c0_i32_0 = arith.constant 0 : i32
    %c0_i32_1 = arith.constant 0 : i32
    return %c0_i32, %c0_i32_0 : i32, i32
  }
  func.func @transform_3(%arg0: i32) -> (i32, i32, i32, i32) {
    %c0_i32 = arith.constant 0 : i32
    %c0_i32_0 = arith.constant 0 : i32
    %c0_i32_1 = arith.constant 0 : i32
    %c0_i32_2 = arith.constant 0 : i32
    return %arg0, %c0_i32, %c0_i32_0, %c0_i32_1 : i32, i32, i32, i32
  }
}

module attributes {stable_mosaic.version = 11 : i64} {
  func.func @_convT_stats_kernel(%arg0: i32, %arg1: memref<2x4x290xbf16, #tpu.memory_space<vmem>>, %arg2: memref<4x4x8x4xbf16, #tpu.memory_space<vmem>>, %arg3: memref<2x256xbf16, #tpu.memory_space<vmem>>, %arg4: memref<2x4x8x256xbf16, #tpu.memory_space<vmem>>, %arg5: memref<1x8x1xf32, #tpu.memory_space<vmem>>, %arg6: memref<1x8x1xf32, #tpu.memory_space<vmem>>) attributes {dimension_semantics = [#tpu.dimension_semantics<parallel>], iteration_bounds = array<i64: 1>, scalar_prefetch = 0 : i64, scratch_operands = 0 : i64, tpu.core_type = #tpu.core_type<tc>, window_params = [{transform_indices = @transform_0, window_bounds = array<i64: 2, 4, 290>}, {pipeline_mode = #tpu.pipeline_mode<synchronous>, transform_indices = @transform_1, window_bounds = array<i64: 4, 4, 8, 4>}, {pipeline_mode = #tpu.pipeline_mode<synchronous>, transform_indices = @transform_2, window_bounds = array<i64: 2, 256>}, {transform_indices = @transform_3, window_bounds = array<i64: 2, 4, 8, 256>}, {transform_indices = @transform_4, window_bounds = array<i64: 1, 8, 1>}, {transform_indices = @transform_5, window_bounds = array<i64: 1, 8, 1>}]} {
    %c0 = arith.constant 0 : index
    %c0_0 = arith.constant 0 : index
    %0 = vector.load %arg3[%c0, %c0_0] : memref<2x256xbf16, #tpu.memory_space<vmem>>, vector<1x256xbf16>
    %c1 = arith.constant 1 : index
    %c0_1 = arith.constant 0 : index
    %1 = vector.load %arg3[%c1, %c0_1] : memref<2x256xbf16, #tpu.memory_space<vmem>>, vector<1x256xbf16>
    %cst = arith.constant 0.000000e+00 : f32
    %2 = vector.broadcast %cst : f32 to vector<8x1xf32>
    %cst_2 = arith.constant 0.000000e+00 : f32
    %3 = vector.broadcast %cst_2 : f32 to vector<8x1xf32>
    %c0_3 = arith.constant 0 : index
    %c0_4 = arith.constant 0 : index
    %c0_5 = arith.constant 0 : index
    %4 = vector.load %arg1[%c0_3, %c0_4, %c0_5] : memref<2x4x290xbf16, #tpu.memory_space<vmem>>, vector<1x4x290xbf16>
    %5 = vector.shape_cast %4 : vector<1x4x290xbf16> to vector<4x290xbf16>
    %cst_6 = arith.constant 0.000000e+00 : f32
    %6 = vector.broadcast %cst_6 : f32 to vector<8x256xf32>
    %7 = vector.extract_strided_slice %5 {offsets = [0, 17], sizes = [4, 256], strides = [1, 1]} : vector<4x290xbf16> to vector<4x256xbf16>
    %c0_7 = arith.constant 0 : index
    %c0_8 = arith.constant 0 : index
    %c0_9 = arith.constant 0 : index
    %c0_10 = arith.constant 0 : index
    %8 = vector.load %arg2[%c0_7, %c0_8, %c0_9, %c0_10] : memref<4x4x8x4xbf16, #tpu.memory_space<vmem>>, vector<1x1x8x4xbf16>
    %9 = vector.shape_cast %8 : vector<1x1x8x4xbf16> to vector<8x4xbf16>
    %cst_11 = arith.constant dense<0.000000e+00> : vector<8x256xf32>
    %10 = tpu.matmul %9, %7, %cst_11 {dimension_numbers = #tpu.dot_dimension_numbers<[1], [0], [0], [1], [0, 0, 1, 1], [], []>} : vector<8x4xbf16>, vector<4x256xbf16>, vector<8x256xf32> -> vector<8x256xf32>
    %11 = arith.addf %6, %10 : vector<8x256xf32>
    %12 = vector.extract_strided_slice %5 {offsets = [0, 16], sizes = [4, 256], strides = [1, 1]} : vector<4x290xbf16> to vector<4x256xbf16>
    %13 = vector.broadcast %0 : vector<1x256xbf16> to vector<4x256xbf16>
    %14 = arith.mulf %12, %13 : vector<4x256xbf16>
    %c0_12 = arith.constant 0 : index
    %c1_13 = arith.constant 1 : index
    %c0_14 = arith.constant 0 : index
    %c0_15 = arith.constant 0 : index
    %15 = vector.load %arg2[%c0_12, %c1_13, %c0_14, %c0_15] : memref<4x4x8x4xbf16, #tpu.memory_space<vmem>>, vector<1x1x8x4xbf16>
    %16 = vector.shape_cast %15 : vector<1x1x8x4xbf16> to vector<8x4xbf16>
    %cst_16 = arith.constant dense<0.000000e+00> : vector<8x256xf32>
    %17 = tpu.matmul %16, %14, %cst_16 {dimension_numbers = #tpu.dot_dimension_numbers<[1], [0], [0], [1], [0, 0, 1, 1], [], []>} : vector<8x4xbf16>, vector<4x256xbf16>, vector<8x256xf32> -> vector<8x256xf32>
    %18 = arith.addf %11, %17 : vector<8x256xf32>
    %19 = vector.extract_strided_slice %5 {offsets = [0, 1], sizes = [4, 256], strides = [1, 1]} : vector<4x290xbf16> to vector<4x256xbf16>
    %c0_17 = arith.constant 0 : index
    %c2 = arith.constant 2 : index
    %c0_18 = arith.constant 0 : index
    %c0_19 = arith.constant 0 : index
    %20 = vector.load %arg2[%c0_17, %c2, %c0_18, %c0_19] : memref<4x4x8x4xbf16, #tpu.memory_space<vmem>>, vector<1x1x8x4xbf16>
    %21 = vector.shape_cast %20 : vector<1x1x8x4xbf16> to vector<8x4xbf16>
    %cst_20 = arith.constant dense<0.000000e+00> : vector<8x256xf32>
    %22 = tpu.matmul %21, %19, %cst_20 {dimension_numbers = #tpu.dot_dimension_numbers<[1], [0], [0], [1], [0, 0, 1, 1], [], []>} : vector<8x4xbf16>, vector<4x256xbf16>, vector<8x256xf32> -> vector<8x256xf32>
    %23 = arith.addf %18, %22 : vector<8x256xf32>
    %24 = vector.extract_strided_slice %5 {offsets = [0, 0], sizes = [4, 256], strides = [1, 1]} : vector<4x290xbf16> to vector<4x256xbf16>
    %25 = vector.broadcast %0 : vector<1x256xbf16> to vector<4x256xbf16>
    %26 = arith.mulf %24, %25 : vector<4x256xbf16>
    %c0_21 = arith.constant 0 : index
    %c3 = arith.constant 3 : index
    %c0_22 = arith.constant 0 : index
    %c0_23 = arith.constant 0 : index
    %27 = vector.load %arg2[%c0_21, %c3, %c0_22, %c0_23] : memref<4x4x8x4xbf16, #tpu.memory_space<vmem>>, vector<1x1x8x4xbf16>
    %28 = vector.shape_cast %27 : vector<1x1x8x4xbf16> to vector<8x4xbf16>
    %cst_24 = arith.constant dense<0.000000e+00> : vector<8x256xf32>
    %29 = tpu.matmul %28, %26, %cst_24 {dimension_numbers = #tpu.dot_dimension_numbers<[1], [0], [0], [1], [0, 0, 1, 1], [], []>} : vector<8x4xbf16>, vector<4x256xbf16>, vector<8x256xf32> -> vector<8x256xf32>
    %30 = arith.addf %23, %29 : vector<8x256xf32>
    %31 = arith.truncf %30 : vector<8x256xf32> to vector<8x256xbf16>
    %c0_25 = arith.constant 0 : index
    %c0_26 = arith.constant 0 : index
    %c0_27 = arith.constant 0 : index
    %c0_28 = arith.constant 0 : index
    %32 = vector.load %arg4[%c0_25, %c0_26, %c0_27, %c0_28] : memref<2x4x8x256xbf16, #tpu.memory_space<vmem>>, vector<1x1x8x256xbf16>
    %33 = vector.shape_cast %32 : vector<1x1x8x256xbf16> to vector<8x256xbf16>
    %34 = vector.shape_cast %31 : vector<8x256xbf16> to vector<1x1x8x256xbf16>
    tpu.vector_store %arg4[%c0_25, %c0_26, %c0_27, %c0_28], %34 {strides = array<i32>} : memref<2x4x8x256xbf16, #tpu.memory_space<vmem>>, vector<1x1x8x256xbf16>,
    %cst_29 = arith.constant dense<0.000000e+00> : vector<8xf32>
    %35 = vector.multi_reduction <add>, %30, %cst_29 [1] : vector<8x256xf32> to vector<8xf32>
    %36 = vector.shape_cast %35 : vector<8xf32> to vector<8x1xf32>
    %37 = arith.addf %2, %36 : vector<8x1xf32>
    %38 = arith.mulf %30, %30 : vector<8x256xf32>
    %cst_30 = arith.constant dense<0.000000e+00> : vector<8xf32>
    %39 = vector.multi_reduction <add>, %38, %cst_30 [1] : vector<8x256xf32> to vector<8xf32>
    %40 = vector.shape_cast %39 : vector<8xf32> to vector<8x1xf32>
    %41 = arith.addf %3, %40 : vector<8x1xf32>
    %cst_31 = arith.constant 0.000000e+00 : f32
    %42 = vector.broadcast %cst_31 : f32 to vector<8x256xf32>
    %43 = vector.extract_strided_slice %5 {offsets = [0, 17], sizes = [4, 256], strides = [1, 1]} : vector<4x290xbf16> to vector<4x256xbf16>
    %c1_32 = arith.constant 1 : index
    %c0_33 = arith.constant 0 : index
    %c0_34 = arith.constant 0 : index
    %c0_35 = arith.constant 0 : index
    %44 = vector.load %arg2[%c1_32, %c0_33, %c0_34, %c0_35] : memref<4x4x8x4xbf16, #tpu.memory_space<vmem>>, vector<1x1x8x4xbf16>
    %45 = vector.shape_cast %44 : vector<1x1x8x4xbf16> to vector<8x4xbf16>
    %cst_36 = arith.constant dense<0.000000e+00> : vector<8x256xf32>
    %46 = tpu.matmul %45, %43, %cst_36 {dimension_numbers = #tpu.dot_dimension_numbers<[1], [0], [0], [1], [0, 0, 1, 1], [], []>} : vector<8x4xbf16>, vector<4x256xbf16>, vector<8x256xf32> -> vector<8x256xf32>
    %47 = arith.addf %42, %46 : vector<8x256xf32>
    %48 = vector.extract_strided_slice %5 {offsets = [0, 18], sizes = [4, 256], strides = [1, 1]} : vector<4x290xbf16> to vector<4x256xbf16>
    %49 = vector.broadcast %1 : vector<1x256xbf16> to vector<4x256xbf16>
    %50 = arith.mulf %48, %49 : vector<4x256xbf16>
    %c1_37 = arith.constant 1 : index
    %c1_38 = arith.constant 1 : index
    %c0_39 = arith.constant 0 : index
    %c0_40 = arith.constant 0 : index
    %51 = vector.load %arg2[%c1_37, %c1_38, %c0_39, %c0_40] : memref<4x4x8x4xbf16, #tpu.memory_space<vmem>>, vector<1x1x8x4xbf16>
    %52 = vector.shape_cast %51 : vector<1x1x8x4xbf16> to vector<8x4xbf16>
    %cst_41 = arith.constant dense<0.000000e+00> : vector<8x256xf32>
    %53 = tpu.matmul %52, %50, %cst_41 {dimension_numbers = #tpu.dot_dimension_numbers<[1], [0], [0], [1], [0, 0, 1, 1], [], []>} : vector<8x4xbf16>, vector<4x256xbf16>, vector<8x256xf32> -> vector<8x256xf32>
    %54 = arith.addf %47, %53 : vector<8x256xf32>
    %55 = vector.extract_strided_slice %5 {offsets = [0, 1], sizes = [4, 256], strides = [1, 1]} : vector<4x290xbf16> to vector<4x256xbf16>
    %c1_42 = arith.constant 1 : index
    %c2_43 = arith.constant 2 : index
    %c0_44 = arith.constant 0 : index
    %c0_45 = arith.constant 0 : index
    %56 = vector.load %arg2[%c1_42, %c2_43, %c0_44, %c0_45] : memref<4x4x8x4xbf16, #tpu.memory_space<vmem>>, vector<1x1x8x4xbf16>
    %57 = vector.shape_cast %56 : vector<1x1x8x4xbf16> to vector<8x4xbf16>
    %cst_46 = arith.constant dense<0.000000e+00> : vector<8x256xf32>
    %58 = tpu.matmul %57, %55, %cst_46 {dimension_numbers = #tpu.dot_dimension_numbers<[1], [0], [0], [1], [0, 0, 1, 1], [], []>} : vector<8x4xbf16>, vector<4x256xbf16>, vector<8x256xf32> -> vector<8x256xf32>
    %59 = arith.addf %54, %58 : vector<8x256xf32>
    %60 = vector.extract_strided_slice %5 {offsets = [0, 2], sizes = [4, 256], strides = [1, 1]} : vector<4x290xbf16> to vector<4x256xbf16>
    %61 = vector.broadcast %1 : vector<1x256xbf16> to vector<4x256xbf16>
    %62 = arith.mulf %60, %61 : vector<4x256xbf16>
    %c1_47 = arith.constant 1 : index
    %c3_48 = arith.constant 3 : index
    %c0_49 = arith.constant 0 : index
    %c0_50 = arith.constant 0 : index
    %63 = vector.load %arg2[%c1_47, %c3_48, %c0_49, %c0_50] : memref<4x4x8x4xbf16, #tpu.memory_space<vmem>>, vector<1x1x8x4xbf16>
    %64 = vector.shape_cast %63 : vector<1x1x8x4xbf16> to vector<8x4xbf16>
    %cst_51 = arith.constant dense<0.000000e+00> : vector<8x256xf32>
    %65 = tpu.matmul %64, %62, %cst_51 {dimension_numbers = #tpu.dot_dimension_numbers<[1], [0], [0], [1], [0, 0, 1, 1], [], []>} : vector<8x4xbf16>, vector<4x256xbf16>, vector<8x256xf32> -> vector<8x256xf32>
    %66 = arith.addf %59, %65 : vector<8x256xf32>
    %67 = arith.truncf %66 : vector<8x256xf32> to vector<8x256xbf16>
    %c0_52 = arith.constant 0 : index
    %c1_53 = arith.constant 1 : index
    %c0_54 = arith.constant 0 : index
    %c0_55 = arith.constant 0 : index
    %68 = vector.load %arg4[%c0_52, %c1_53, %c0_54, %c0_55] : memref<2x4x8x256xbf16, #tpu.memory_space<vmem>>, vector<1x1x8x256xbf16>
    %69 = vector.shape_cast %68 : vector<1x1x8x256xbf16> to vector<8x256xbf16>
    %70 = vector.shape_cast %67 : vector<8x256xbf16> to vector<1x1x8x256xbf16>
    tpu.vector_store %arg4[%c0_52, %c1_53, %c0_54, %c0_55], %70 {strides = array<i32>} : memref<2x4x8x256xbf16, #tpu.memory_space<vmem>>, vector<1x1x8x256xbf16>,
    %cst_56 = arith.constant dense<0.000000e+00> : vector<8xf32>
    %71 = vector.multi_reduction <add>, %66, %cst_56 [1] : vector<8x256xf32> to vector<8xf32>
    %72 = vector.shape_cast %71 : vector<8xf32> to vector<8x1xf32>
    %73 = arith.addf %37, %72 : vector<8x1xf32>
    %74 = arith.mulf %66, %66 : vector<8x256xf32>
    %cst_57 = arith.constant dense<0.000000e+00> : vector<8xf32>
    %75 = vector.multi_reduction <add>, %74, %cst_57 [1] : vector<8x256xf32> to vector<8xf32>
    %76 = vector.shape_cast %75 : vector<8xf32> to vector<8x1xf32>
    %77 = arith.addf %41, %76 : vector<8x1xf32>
    %cst_58 = arith.constant 0.000000e+00 : f32
    %78 = vector.broadcast %cst_58 : f32 to vector<8x256xf32>
    %79 = vector.extract_strided_slice %5 {offsets = [0, 17], sizes = [4, 256], strides = [1, 1]} : vector<4x290xbf16> to vector<4x256xbf16>
    %c2_59 = arith.constant 2 : index
    %c0_60 = arith.constant 0 : index
    %c0_61 = arith.constant 0 : index
    %c0_62 = arith.constant 0 : index
    %80 = vector.load %arg2[%c2_59, %c0_60, %c0_61, %c0_62] : memref<4x4x8x4xbf16, #tpu.memory_space<vmem>>, vector<1x1x8x4xbf16>
    %81 = vector.shape_cast %80 : vector<1x1x8x4xbf16> to vector<8x4xbf16>
    %cst_63 = arith.constant dense<0.000000e+00> : vector<8x256xf32>
    %82 = tpu.matmul %81, %79, %cst_63 {dimension_numbers = #tpu.dot_dimension_numbers<[1], [0], [0], [1], [0, 0, 1, 1], [], []>} : vector<8x4xbf16>, vector<4x256xbf16>, vector<8x256xf32> -> vector<8x256xf32>
    %83 = arith.addf %78, %82 : vector<8x256xf32>
    %84 = vector.extract_strided_slice %5 {offsets = [0, 16], sizes = [4, 256], strides = [1, 1]} : vector<4x290xbf16> to vector<4x256xbf16>
    %85 = vector.broadcast %0 : vector<1x256xbf16> to vector<4x256xbf16>
    %86 = arith.mulf %84, %85 : vector<4x256xbf16>
    %c2_64 = arith.constant 2 : index
    %c1_65 = arith.constant 1 : index
    %c0_66 = arith.constant 0 : index
    %c0_67 = arith.constant 0 : index
    %87 = vector.load %arg2[%c2_64, %c1_65, %c0_66, %c0_67] : memref<4x4x8x4xbf16, #tpu.memory_space<vmem>>, vector<1x1x8x4xbf16>
    %88 = vector.shape_cast %87 : vector<1x1x8x4xbf16> to vector<8x4xbf16>
    %cst_68 = arith.constant dense<0.000000e+00> : vector<8x256xf32>
    %89 = tpu.matmul %88, %86, %cst_68 {dimension_numbers = #tpu.dot_dimension_numbers<[1], [0], [0], [1], [0, 0, 1, 1], [], []>} : vector<8x4xbf16>, vector<4x256xbf16>, vector<8x256xf32> -> vector<8x256xf32>
    %90 = arith.addf %83, %89 : vector<8x256xf32>
    %91 = vector.extract_strided_slice %5 {offsets = [0, 33], sizes = [4, 256], strides = [1, 1]} : vector<4x290xbf16> to vector<4x256xbf16>
    %c2_69 = arith.constant 2 : index
    %c2_70 = arith.constant 2 : index
    %c0_71 = arith.constant 0 : index
    %c0_72 = arith.constant 0 : index
    %92 = vector.load %arg2[%c2_69, %c2_70, %c0_71, %c0_72] : memref<4x4x8x4xbf16, #tpu.memory_space<vmem>>, vector<1x1x8x4xbf16>
    %93 = vector.shape_cast %92 : vector<1x1x8x4xbf16> to vector<8x4xbf16>
    %cst_73 = arith.constant dense<0.000000e+00> : vector<8x256xf32>
    %94 = tpu.matmul %93, %91, %cst_73 {dimension_numbers = #tpu.dot_dimension_numbers<[1], [0], [0], [1], [0, 0, 1, 1], [], []>} : vector<8x4xbf16>, vector<4x256xbf16>, vector<8x256xf32> -> vector<8x256xf32>
    %95 = arith.addf %90, %94 : vector<8x256xf32>
    %96 = vector.extract_strided_slice %5 {offsets = [0, 32], sizes = [4, 256], strides = [1, 1]} : vector<4x290xbf16> to vector<4x256xbf16>
    %97 = vector.broadcast %0 : vector<1x256xbf16> to vector<4x256xbf16>
    %98 = arith.mulf %96, %97 : vector<4x256xbf16>
    %c2_74 = arith.constant 2 : index
    %c3_75 = arith.constant 3 : index
    %c0_76 = arith.constant 0 : index
    %c0_77 = arith.constant 0 : index
    %99 = vector.load %arg2[%c2_74, %c3_75, %c0_76, %c0_77] : memref<4x4x8x4xbf16, #tpu.memory_space<vmem>>, vector<1x1x8x4xbf16>
    %100 = vector.shape_cast %99 : vector<1x1x8x4xbf16> to vector<8x4xbf16>
    %cst_78 = arith.constant dense<0.000000e+00> : vector<8x256xf32>
    %101 = tpu.matmul %100, %98, %cst_78 {dimension_numbers = #tpu.dot_dimension_numbers<[1], [0], [0], [1], [0, 0, 1, 1], [], []>} : vector<8x4xbf16>, vector<4x256xbf16>, vector<8x256xf32> -> vector<8x256xf32>
    %102 = arith.addf %95, %101 : vector<8x256xf32>
    %103 = arith.truncf %102 : vector<8x256xf32> to vector<8x256xbf16>
    %c0_79 = arith.constant 0 : index
    %c2_80 = arith.constant 2 : index
    %c0_81 = arith.constant 0 : index
    %c0_82 = arith.constant 0 : index
    %104 = vector.load %arg4[%c0_79, %c2_80, %c0_81, %c0_82] : memref<2x4x8x256xbf16, #tpu.memory_space<vmem>>, vector<1x1x8x256xbf16>
    %105 = vector.shape_cast %104 : vector<1x1x8x256xbf16> to vector<8x256xbf16>
    %106 = vector.shape_cast %103 : vector<8x256xbf16> to vector<1x1x8x256xbf16>
    tpu.vector_store %arg4[%c0_79, %c2_80, %c0_81, %c0_82], %106 {strides = array<i32>} : memref<2x4x8x256xbf16, #tpu.memory_space<vmem>>, vector<1x1x8x256xbf16>,
    %cst_83 = arith.constant dense<0.000000e+00> : vector<8xf32>
    %107 = vector.multi_reduction <add>, %102, %cst_83 [1] : vector<8x256xf32> to vector<8xf32>
    %108 = vector.shape_cast %107 : vector<8xf32> to vector<8x1xf32>
    %109 = arith.addf %73, %108 : vector<8x1xf32>
    %110 = arith.mulf %102, %102 : vector<8x256xf32>
    %cst_84 = arith.constant dense<0.000000e+00> : vector<8xf32>
    %111 = vector.multi_reduction <add>, %110, %cst_84 [1] : vector<8x256xf32> to vector<8xf32>
    %112 = vector.shape_cast %111 : vector<8xf32> to vector<8x1xf32>
    %113 = arith.addf %77, %112 : vector<8x1xf32>
    %cst_85 = arith.constant 0.000000e+00 : f32
    %114 = vector.broadcast %cst_85 : f32 to vector<8x256xf32>
    %115 = vector.extract_strided_slice %5 {offsets = [0, 17], sizes = [4, 256], strides = [1, 1]} : vector<4x290xbf16> to vector<4x256xbf16>
    %c3_86 = arith.constant 3 : index
    %c0_87 = arith.constant 0 : index
    %c0_88 = arith.constant 0 : index
    %c0_89 = arith.constant 0 : index
    %116 = vector.load %arg2[%c3_86, %c0_87, %c0_88, %c0_89] : memref<4x4x8x4xbf16, #tpu.memory_space<vmem>>, vector<1x1x8x4xbf16>
    %117 = vector.shape_cast %116 : vector<1x1x8x4xbf16> to vector<8x4xbf16>
    %cst_90 = arith.constant dense<0.000000e+00> : vector<8x256xf32>
    %118 = tpu.matmul %117, %115, %cst_90 {dimension_numbers = #tpu.dot_dimension_numbers<[1], [0], [0], [1], [0, 0, 1, 1], [], []>} : vector<8x4xbf16>, vector<4x256xbf16>, vector<8x256xf32> -> vector<8x256xf32>
    %119 = arith.addf %114, %118 : vector<8x256xf32>
    %120 = vector.extract_strided_slice %5 {offsets = [0, 18], sizes = [4, 256], strides = [1, 1]} : vector<4x290xbf16> to vector<4x256xbf16>
    %121 = vector.broadcast %1 : vector<1x256xbf16> to vector<4x256xbf16>
    %122 = arith.mulf %120, %121 : vector<4x256xbf16>
    %c3_91 = arith.constant 3 : index
    %c1_92 = arith.constant 1 : index
    %c0_93 = arith.constant 0 : index
    %c0_94 = arith.constant 0 : index
    %123 = vector.load %arg2[%c3_91, %c1_92, %c0_93, %c0_94] : memref<4x4x8x4xbf16, #tpu.memory_space<vmem>>, vector<1x1x8x4xbf16>
    %124 = vector.shape_cast %123 : vector<1x1x8x4xbf16> to vector<8x4xbf16>
    %cst_95 = arith.constant dense<0.000000e+00> : vector<8x256xf32>
    %125 = tpu.matmul %124, %122, %cst_95 {dimension_numbers = #tpu.dot_dimension_numbers<[1], [0], [0], [1], [0, 0, 1, 1], [], []>} : vector<8x4xbf16>, vector<4x256xbf16>, vector<8x256xf32> -> vector<8x256xf32>
    %126 = arith.addf %119, %125 : vector<8x256xf32>
    %127 = vector.extract_strided_slice %5 {offsets = [0, 33], sizes = [4, 256], strides = [1, 1]} : vector<4x290xbf16> to vector<4x256xbf16>
    %c3_96 = arith.constant 3 : index
    %c2_97 = arith.constant 2 : index
    %c0_98 = arith.constant 0 : index
    %c0_99 = arith.constant 0 : index
    %128 = vector.load %arg2[%c3_96, %c2_97, %c0_98, %c0_99] : memref<4x4x8x4xbf16, #tpu.memory_space<vmem>>, vector<1x1x8x4xbf16>
    %129 = vector.shape_cast %128 : vector<1x1x8x4xbf16> to vector<8x4xbf16>
    %cst_100 = arith.constant dense<0.000000e+00> : vector<8x256xf32>
    %130 = tpu.matmul %129, %127, %cst_100 {dimension_numbers = #tpu.dot_dimension_numbers<[1], [0], [0], [1], [0, 0, 1, 1], [], []>} : vector<8x4xbf16>, vector<4x256xbf16>, vector<8x256xf32> -> vector<8x256xf32>
    %131 = arith.addf %126, %130 : vector<8x256xf32>
    %132 = vector.extract_strided_slice %5 {offsets = [0, 34], sizes = [4, 256], strides = [1, 1]} : vector<4x290xbf16> to vector<4x256xbf16>
    %133 = vector.broadcast %1 : vector<1x256xbf16> to vector<4x256xbf16>
    %134 = arith.mulf %132, %133 : vector<4x256xbf16>
    %c3_101 = arith.constant 3 : index
    %c3_102 = arith.constant 3 : index
    %c0_103 = arith.constant 0 : index
    %c0_104 = arith.constant 0 : index
    %135 = vector.load %arg2[%c3_101, %c3_102, %c0_103, %c0_104] : memref<4x4x8x4xbf16, #tpu.memory_space<vmem>>, vector<1x1x8x4xbf16>
    %136 = vector.shape_cast %135 : vector<1x1x8x4xbf16> to vector<8x4xbf16>
    %cst_105 = arith.constant dense<0.000000e+00> : vector<8x256xf32>
    %137 = tpu.matmul %136, %134, %cst_105 {dimension_numbers = #tpu.dot_dimension_numbers<[1], [0], [0], [1], [0, 0, 1, 1], [], []>} : vector<8x4xbf16>, vector<4x256xbf16>, vector<8x256xf32> -> vector<8x256xf32>
    %138 = arith.addf %131, %137 : vector<8x256xf32>
    %139 = arith.truncf %138 : vector<8x256xf32> to vector<8x256xbf16>
    %c0_106 = arith.constant 0 : index
    %c3_107 = arith.constant 3 : index
    %c0_108 = arith.constant 0 : index
    %c0_109 = arith.constant 0 : index
    %140 = vector.load %arg4[%c0_106, %c3_107, %c0_108, %c0_109] : memref<2x4x8x256xbf16, #tpu.memory_space<vmem>>, vector<1x1x8x256xbf16>
    %141 = vector.shape_cast %140 : vector<1x1x8x256xbf16> to vector<8x256xbf16>
    %142 = vector.shape_cast %139 : vector<8x256xbf16> to vector<1x1x8x256xbf16>
    tpu.vector_store %arg4[%c0_106, %c3_107, %c0_108, %c0_109], %142 {strides = array<i32>} : memref<2x4x8x256xbf16, #tpu.memory_space<vmem>>, vector<1x1x8x256xbf16>,
    %cst_110 = arith.constant dense<0.000000e+00> : vector<8xf32>
    %143 = vector.multi_reduction <add>, %138, %cst_110 [1] : vector<8x256xf32> to vector<8xf32>
    %144 = vector.shape_cast %143 : vector<8xf32> to vector<8x1xf32>
    %145 = arith.addf %109, %144 : vector<8x1xf32>
    %146 = arith.mulf %138, %138 : vector<8x256xf32>
    %cst_111 = arith.constant dense<0.000000e+00> : vector<8xf32>
    %147 = vector.multi_reduction <add>, %146, %cst_111 [1] : vector<8x256xf32> to vector<8xf32>
    %148 = vector.shape_cast %147 : vector<8xf32> to vector<8x1xf32>
    %149 = arith.addf %113, %148 : vector<8x1xf32>
    %c1_112 = arith.constant 1 : index
    %c0_113 = arith.constant 0 : index
    %c0_114 = arith.constant 0 : index
    %150 = vector.load %arg1[%c1_112, %c0_113, %c0_114] : memref<2x4x290xbf16, #tpu.memory_space<vmem>>, vector<1x4x290xbf16>
    %151 = vector.shape_cast %150 : vector<1x4x290xbf16> to vector<4x290xbf16>
    %cst_115 = arith.constant 0.000000e+00 : f32
    %152 = vector.broadcast %cst_115 : f32 to vector<8x256xf32>
    %153 = vector.extract_strided_slice %151 {offsets = [0, 17], sizes = [4, 256], strides = [1, 1]} : vector<4x290xbf16> to vector<4x256xbf16>
    %c0_116 = arith.constant 0 : index
    %c0_117 = arith.constant 0 : index
    %c0_118 = arith.constant 0 : index
    %c0_119 = arith.constant 0 : index
    %154 = vector.load %arg2[%c0_116, %c0_117, %c0_118, %c0_119] : memref<4x4x8x4xbf16, #tpu.memory_space<vmem>>, vector<1x1x8x4xbf16>
    %155 = vector.shape_cast %154 : vector<1x1x8x4xbf16> to vector<8x4xbf16>
    %cst_120 = arith.constant dense<0.000000e+00> : vector<8x256xf32>
    %156 = tpu.matmul %155, %153, %cst_120 {dimension_numbers = #tpu.dot_dimension_numbers<[1], [0], [0], [1], [0, 0, 1, 1], [], []>} : vector<8x4xbf16>, vector<4x256xbf16>, vector<8x256xf32> -> vector<8x256xf32>
    %157 = arith.addf %152, %156 : vector<8x256xf32>
    %158 = vector.extract_strided_slice %151 {offsets = [0, 16], sizes = [4, 256], strides = [1, 1]} : vector<4x290xbf16> to vector<4x256xbf16>
    %159 = vector.broadcast %0 : vector<1x256xbf16> to vector<4x256xbf16>
    %160 = arith.mulf %158, %159 : vector<4x256xbf16>
    %c0_121 = arith.constant 0 : index
    %c1_122 = arith.constant 1 : index
    %c0_123 = arith.constant 0 : index
    %c0_124 = arith.constant 0 : index
    %161 = vector.load %arg2[%c0_121, %c1_122, %c0_123, %c0_124] : memref<4x4x8x4xbf16, #tpu.memory_space<vmem>>, vector<1x1x8x4xbf16>
    %162 = vector.shape_cast %161 : vector<1x1x8x4xbf16> to vector<8x4xbf16>
    %cst_125 = arith.constant dense<0.000000e+00> : vector<8x256xf32>
    %163 = tpu.matmul %162, %160, %cst_125 {dimension_numbers = #tpu.dot_dimension_numbers<[1], [0], [0], [1], [0, 0, 1, 1], [], []>} : vector<8x4xbf16>, vector<4x256xbf16>, vector<8x256xf32> -> vector<8x256xf32>
    %164 = arith.addf %157, %163 : vector<8x256xf32>
    %165 = vector.extract_strided_slice %151 {offsets = [0, 1], sizes = [4, 256], strides = [1, 1]} : vector<4x290xbf16> to vector<4x256xbf16>
    %c0_126 = arith.constant 0 : index
    %c2_127 = arith.constant 2 : index
    %c0_128 = arith.constant 0 : index
    %c0_129 = arith.constant 0 : index
    %166 = vector.load %arg2[%c0_126, %c2_127, %c0_128, %c0_129] : memref<4x4x8x4xbf16, #tpu.memory_space<vmem>>, vector<1x1x8x4xbf16>
    %167 = vector.shape_cast %166 : vector<1x1x8x4xbf16> to vector<8x4xbf16>
    %cst_130 = arith.constant dense<0.000000e+00> : vector<8x256xf32>
    %168 = tpu.matmul %167, %165, %cst_130 {dimension_numbers = #tpu.dot_dimension_numbers<[1], [0], [0], [1], [0, 0, 1, 1], [], []>} : vector<8x4xbf16>, vector<4x256xbf16>, vector<8x256xf32> -> vector<8x256xf32>
    %169 = arith.addf %164, %168 : vector<8x256xf32>
    %170 = vector.extract_strided_slice %151 {offsets = [0, 0], sizes = [4, 256], strides = [1, 1]} : vector<4x290xbf16> to vector<4x256xbf16>
    %171 = vector.broadcast %0 : vector<1x256xbf16> to vector<4x256xbf16>
    %172 = arith.mulf %170, %171 : vector<4x256xbf16>
    %c0_131 = arith.constant 0 : index
    %c3_132 = arith.constant 3 : index
    %c0_133 = arith.constant 0 : index
    %c0_134 = arith.constant 0 : index
    %173 = vector.load %arg2[%c0_131, %c3_132, %c0_133, %c0_134] : memref<4x4x8x4xbf16, #tpu.memory_space<vmem>>, vector<1x1x8x4xbf16>
    %174 = vector.shape_cast %173 : vector<1x1x8x4xbf16> to vector<8x4xbf16>
    %cst_135 = arith.constant dense<0.000000e+00> : vector<8x256xf32>
    %175 = tpu.matmul %174, %172, %cst_135 {dimension_numbers = #tpu.dot_dimension_numbers<[1], [0], [0], [1], [0, 0, 1, 1], [], []>} : vector<8x4xbf16>, vector<4x256xbf16>, vector<8x256xf32> -> vector<8x256xf32>
    %176 = arith.addf %169, %175 : vector<8x256xf32>
    %177 = arith.truncf %176 : vector<8x256xf32> to vector<8x256xbf16>
    %c1_136 = arith.constant 1 : index
    %c0_137 = arith.constant 0 : index
    %c0_138 = arith.constant 0 : index
    %c0_139 = arith.constant 0 : index
    %178 = vector.load %arg4[%c1_136, %c0_137, %c0_138, %c0_139] : memref<2x4x8x256xbf16, #tpu.memory_space<vmem>>, vector<1x1x8x256xbf16>
    %179 = vector.shape_cast %178 : vector<1x1x8x256xbf16> to vector<8x256xbf16>
    %180 = vector.shape_cast %177 : vector<8x256xbf16> to vector<1x1x8x256xbf16>
    tpu.vector_store %arg4[%c1_136, %c0_137, %c0_138, %c0_139], %180 {strides = array<i32>} : memref<2x4x8x256xbf16, #tpu.memory_space<vmem>>, vector<1x1x8x256xbf16>,
    %cst_140 = arith.constant dense<0.000000e+00> : vector<8xf32>
    %181 = vector.multi_reduction <add>, %176, %cst_140 [1] : vector<8x256xf32> to vector<8xf32>
    %182 = vector.shape_cast %181 : vector<8xf32> to vector<8x1xf32>
    %183 = arith.addf %145, %182 : vector<8x1xf32>
    %184 = arith.mulf %176, %176 : vector<8x256xf32>
    %cst_141 = arith.constant dense<0.000000e+00> : vector<8xf32>
    %185 = vector.multi_reduction <add>, %184, %cst_141 [1] : vector<8x256xf32> to vector<8xf32>
    %186 = vector.shape_cast %185 : vector<8xf32> to vector<8x1xf32>
    %187 = arith.addf %149, %186 : vector<8x1xf32>
    %cst_142 = arith.constant 0.000000e+00 : f32
    %188 = vector.broadcast %cst_142 : f32 to vector<8x256xf32>
    %189 = vector.extract_strided_slice %151 {offsets = [0, 17], sizes = [4, 256], strides = [1, 1]} : vector<4x290xbf16> to vector<4x256xbf16>
    %c1_143 = arith.constant 1 : index
    %c0_144 = arith.constant 0 : index
    %c0_145 = arith.constant 0 : index
    %c0_146 = arith.constant 0 : index
    %190 = vector.load %arg2[%c1_143, %c0_144, %c0_145, %c0_146] : memref<4x4x8x4xbf16, #tpu.memory_space<vmem>>, vector<1x1x8x4xbf16>
    %191 = vector.shape_cast %190 : vector<1x1x8x4xbf16> to vector<8x4xbf16>
    %cst_147 = arith.constant dense<0.000000e+00> : vector<8x256xf32>
    %192 = tpu.matmul %191, %189, %cst_147 {dimension_numbers = #tpu.dot_dimension_numbers<[1], [0], [0], [1], [0, 0, 1, 1], [], []>} : vector<8x4xbf16>, vector<4x256xbf16>, vector<8x256xf32> -> vector<8x256xf32>
    %193 = arith.addf %188, %192 : vector<8x256xf32>
    %194 = vector.extract_strided_slice %151 {offsets = [0, 18], sizes = [4, 256], strides = [1, 1]} : vector<4x290xbf16> to vector<4x256xbf16>
    %195 = vector.broadcast %1 : vector<1x256xbf16> to vector<4x256xbf16>
    %196 = arith.mulf %194, %195 : vector<4x256xbf16>
    %c1_148 = arith.constant 1 : index
    %c1_149 = arith.constant 1 : index
    %c0_150 = arith.constant 0 : index
    %c0_151 = arith.constant 0 : index
    %197 = vector.load %arg2[%c1_148, %c1_149, %c0_150, %c0_151] : memref<4x4x8x4xbf16, #tpu.memory_space<vmem>>, vector<1x1x8x4xbf16>
    %198 = vector.shape_cast %197 : vector<1x1x8x4xbf16> to vector<8x4xbf16>
    %cst_152 = arith.constant dense<0.000000e+00> : vector<8x256xf32>
    %199 = tpu.matmul %198, %196, %cst_152 {dimension_numbers = #tpu.dot_dimension_numbers<[1], [0], [0], [1], [0, 0, 1, 1], [], []>} : vector<8x4xbf16>, vector<4x256xbf16>, vector<8x256xf32> -> vector<8x256xf32>
    %200 = arith.addf %193, %199 : vector<8x256xf32>
    %201 = vector.extract_strided_slice %151 {offsets = [0, 1], sizes = [4, 256], strides = [1, 1]} : vector<4x290xbf16> to vector<4x256xbf16>
    %c1_153 = arith.constant 1 : index
    %c2_154 = arith.constant 2 : index
    %c0_155 = arith.constant 0 : index
    %c0_156 = arith.constant 0 : index
    %202 = vector.load %arg2[%c1_153, %c2_154, %c0_155, %c0_156] : memref<4x4x8x4xbf16, #tpu.memory_space<vmem>>, vector<1x1x8x4xbf16>
    %203 = vector.shape_cast %202 : vector<1x1x8x4xbf16> to vector<8x4xbf16>
    %cst_157 = arith.constant dense<0.000000e+00> : vector<8x256xf32>
    %204 = tpu.matmul %203, %201, %cst_157 {dimension_numbers = #tpu.dot_dimension_numbers<[1], [0], [0], [1], [0, 0, 1, 1], [], []>} : vector<8x4xbf16>, vector<4x256xbf16>, vector<8x256xf32> -> vector<8x256xf32>
    %205 = arith.addf %200, %204 : vector<8x256xf32>
    %206 = vector.extract_strided_slice %151 {offsets = [0, 2], sizes = [4, 256], strides = [1, 1]} : vector<4x290xbf16> to vector<4x256xbf16>
    %207 = vector.broadcast %1 : vector<1x256xbf16> to vector<4x256xbf16>
    %208 = arith.mulf %206, %207 : vector<4x256xbf16>
    %c1_158 = arith.constant 1 : index
    %c3_159 = arith.constant 3 : index
    %c0_160 = arith.constant 0 : index
    %c0_161 = arith.constant 0 : index
    %209 = vector.load %arg2[%c1_158, %c3_159, %c0_160, %c0_161] : memref<4x4x8x4xbf16, #tpu.memory_space<vmem>>, vector<1x1x8x4xbf16>
    %210 = vector.shape_cast %209 : vector<1x1x8x4xbf16> to vector<8x4xbf16>
    %cst_162 = arith.constant dense<0.000000e+00> : vector<8x256xf32>
    %211 = tpu.matmul %210, %208, %cst_162 {dimension_numbers = #tpu.dot_dimension_numbers<[1], [0], [0], [1], [0, 0, 1, 1], [], []>} : vector<8x4xbf16>, vector<4x256xbf16>, vector<8x256xf32> -> vector<8x256xf32>
    %212 = arith.addf %205, %211 : vector<8x256xf32>
    %213 = arith.truncf %212 : vector<8x256xf32> to vector<8x256xbf16>
    %c1_163 = arith.constant 1 : index
    %c1_164 = arith.constant 1 : index
    %c0_165 = arith.constant 0 : index
    %c0_166 = arith.constant 0 : index
    %214 = vector.load %arg4[%c1_163, %c1_164, %c0_165, %c0_166] : memref<2x4x8x256xbf16, #tpu.memory_space<vmem>>, vector<1x1x8x256xbf16>
    %215 = vector.shape_cast %214 : vector<1x1x8x256xbf16> to vector<8x256xbf16>
    %216 = vector.shape_cast %213 : vector<8x256xbf16> to vector<1x1x8x256xbf16>
    tpu.vector_store %arg4[%c1_163, %c1_164, %c0_165, %c0_166], %216 {strides = array<i32>} : memref<2x4x8x256xbf16, #tpu.memory_space<vmem>>, vector<1x1x8x256xbf16>,
    %cst_167 = arith.constant dense<0.000000e+00> : vector<8xf32>
    %217 = vector.multi_reduction <add>, %212, %cst_167 [1] : vector<8x256xf32> to vector<8xf32>
    %218 = vector.shape_cast %217 : vector<8xf32> to vector<8x1xf32>
    %219 = arith.addf %183, %218 : vector<8x1xf32>
    %220 = arith.mulf %212, %212 : vector<8x256xf32>
    %cst_168 = arith.constant dense<0.000000e+00> : vector<8xf32>
    %221 = vector.multi_reduction <add>, %220, %cst_168 [1] : vector<8x256xf32> to vector<8xf32>
    %222 = vector.shape_cast %221 : vector<8xf32> to vector<8x1xf32>
    %223 = arith.addf %187, %222 : vector<8x1xf32>
    %cst_169 = arith.constant 0.000000e+00 : f32
    %224 = vector.broadcast %cst_169 : f32 to vector<8x256xf32>
    %225 = vector.extract_strided_slice %151 {offsets = [0, 17], sizes = [4, 256], strides = [1, 1]} : vector<4x290xbf16> to vector<4x256xbf16>
    %c2_170 = arith.constant 2 : index
    %c0_171 = arith.constant 0 : index
    %c0_172 = arith.constant 0 : index
    %c0_173 = arith.constant 0 : index
    %226 = vector.load %arg2[%c2_170, %c0_171, %c0_172, %c0_173] : memref<4x4x8x4xbf16, #tpu.memory_space<vmem>>, vector<1x1x8x4xbf16>
    %227 = vector.shape_cast %226 : vector<1x1x8x4xbf16> to vector<8x4xbf16>
    %cst_174 = arith.constant dense<0.000000e+00> : vector<8x256xf32>
    %228 = tpu.matmul %227, %225, %cst_174 {dimension_numbers = #tpu.dot_dimension_numbers<[1], [0], [0], [1], [0, 0, 1, 1], [], []>} : vector<8x4xbf16>, vector<4x256xbf16>, vector<8x256xf32> -> vector<8x256xf32>
    %229 = arith.addf %224, %228 : vector<8x256xf32>
    %230 = vector.extract_strided_slice %151 {offsets = [0, 16], sizes = [4, 256], strides = [1, 1]} : vector<4x290xbf16> to vector<4x256xbf16>
    %231 = vector.broadcast %0 : vector<1x256xbf16> to vector<4x256xbf16>
    %232 = arith.mulf %230, %231 : vector<4x256xbf16>
    %c2_175 = arith.constant 2 : index
    %c1_176 = arith.constant 1 : index
    %c0_177 = arith.constant 0 : index
    %c0_178 = arith.constant 0 : index
    %233 = vector.load %arg2[%c2_175, %c1_176, %c0_177, %c0_178] : memref<4x4x8x4xbf16, #tpu.memory_space<vmem>>, vector<1x1x8x4xbf16>
    %234 = vector.shape_cast %233 : vector<1x1x8x4xbf16> to vector<8x4xbf16>
    %cst_179 = arith.constant dense<0.000000e+00> : vector<8x256xf32>
    %235 = tpu.matmul %234, %232, %cst_179 {dimension_numbers = #tpu.dot_dimension_numbers<[1], [0], [0], [1], [0, 0, 1, 1], [], []>} : vector<8x4xbf16>, vector<4x256xbf16>, vector<8x256xf32> -> vector<8x256xf32>
    %236 = arith.addf %229, %235 : vector<8x256xf32>
    %237 = vector.extract_strided_slice %151 {offsets = [0, 33], sizes = [4, 256], strides = [1, 1]} : vector<4x290xbf16> to vector<4x256xbf16>
    %c2_180 = arith.constant 2 : index
    %c2_181 = arith.constant 2 : index
    %c0_182 = arith.constant 0 : index
    %c0_183 = arith.constant 0 : index
    %238 = vector.load %arg2[%c2_180, %c2_181, %c0_182, %c0_183] : memref<4x4x8x4xbf16, #tpu.memory_space<vmem>>, vector<1x1x8x4xbf16>
    %239 = vector.shape_cast %238 : vector<1x1x8x4xbf16> to vector<8x4xbf16>
    %cst_184 = arith.constant dense<0.000000e+00> : vector<8x256xf32>
    %240 = tpu.matmul %239, %237, %cst_184 {dimension_numbers = #tpu.dot_dimension_numbers<[1], [0], [0], [1], [0, 0, 1, 1], [], []>} : vector<8x4xbf16>, vector<4x256xbf16>, vector<8x256xf32> -> vector<8x256xf32>
    %241 = arith.addf %236, %240 : vector<8x256xf32>
    %242 = vector.extract_strided_slice %151 {offsets = [0, 32], sizes = [4, 256], strides = [1, 1]} : vector<4x290xbf16> to vector<4x256xbf16>
    %243 = vector.broadcast %0 : vector<1x256xbf16> to vector<4x256xbf16>
    %244 = arith.mulf %242, %243 : vector<4x256xbf16>
    %c2_185 = arith.constant 2 : index
    %c3_186 = arith.constant 3 : index
    %c0_187 = arith.constant 0 : index
    %c0_188 = arith.constant 0 : index
    %245 = vector.load %arg2[%c2_185, %c3_186, %c0_187, %c0_188] : memref<4x4x8x4xbf16, #tpu.memory_space<vmem>>, vector<1x1x8x4xbf16>
    %246 = vector.shape_cast %245 : vector<1x1x8x4xbf16> to vector<8x4xbf16>
    %cst_189 = arith.constant dense<0.000000e+00> : vector<8x256xf32>
    %247 = tpu.matmul %246, %244, %cst_189 {dimension_numbers = #tpu.dot_dimension_numbers<[1], [0], [0], [1], [0, 0, 1, 1], [], []>} : vector<8x4xbf16>, vector<4x256xbf16>, vector<8x256xf32> -> vector<8x256xf32>
    %248 = arith.addf %241, %247 : vector<8x256xf32>
    %249 = arith.truncf %248 : vector<8x256xf32> to vector<8x256xbf16>
    %c1_190 = arith.constant 1 : index
    %c2_191 = arith.constant 2 : index
    %c0_192 = arith.constant 0 : index
    %c0_193 = arith.constant 0 : index
    %250 = vector.load %arg4[%c1_190, %c2_191, %c0_192, %c0_193] : memref<2x4x8x256xbf16, #tpu.memory_space<vmem>>, vector<1x1x8x256xbf16>
    %251 = vector.shape_cast %250 : vector<1x1x8x256xbf16> to vector<8x256xbf16>
    %252 = vector.shape_cast %249 : vector<8x256xbf16> to vector<1x1x8x256xbf16>
    tpu.vector_store %arg4[%c1_190, %c2_191, %c0_192, %c0_193], %252 {strides = array<i32>} : memref<2x4x8x256xbf16, #tpu.memory_space<vmem>>, vector<1x1x8x256xbf16>,
    %cst_194 = arith.constant dense<0.000000e+00> : vector<8xf32>
    %253 = vector.multi_reduction <add>, %248, %cst_194 [1] : vector<8x256xf32> to vector<8xf32>
    %254 = vector.shape_cast %253 : vector<8xf32> to vector<8x1xf32>
    %255 = arith.addf %219, %254 : vector<8x1xf32>
    %256 = arith.mulf %248, %248 : vector<8x256xf32>
    %cst_195 = arith.constant dense<0.000000e+00> : vector<8xf32>
    %257 = vector.multi_reduction <add>, %256, %cst_195 [1] : vector<8x256xf32> to vector<8xf32>
    %258 = vector.shape_cast %257 : vector<8xf32> to vector<8x1xf32>
    %259 = arith.addf %223, %258 : vector<8x1xf32>
    %cst_196 = arith.constant 0.000000e+00 : f32
    %260 = vector.broadcast %cst_196 : f32 to vector<8x256xf32>
    %261 = vector.extract_strided_slice %151 {offsets = [0, 17], sizes = [4, 256], strides = [1, 1]} : vector<4x290xbf16> to vector<4x256xbf16>
    %c3_197 = arith.constant 3 : index
    %c0_198 = arith.constant 0 : index
    %c0_199 = arith.constant 0 : index
    %c0_200 = arith.constant 0 : index
    %262 = vector.load %arg2[%c3_197, %c0_198, %c0_199, %c0_200] : memref<4x4x8x4xbf16, #tpu.memory_space<vmem>>, vector<1x1x8x4xbf16>
    %263 = vector.shape_cast %262 : vector<1x1x8x4xbf16> to vector<8x4xbf16>
    %cst_201 = arith.constant dense<0.000000e+00> : vector<8x256xf32>
    %264 = tpu.matmul %263, %261, %cst_201 {dimension_numbers = #tpu.dot_dimension_numbers<[1], [0], [0], [1], [0, 0, 1, 1], [], []>} : vector<8x4xbf16>, vector<4x256xbf16>, vector<8x256xf32> -> vector<8x256xf32>
    %265 = arith.addf %260, %264 : vector<8x256xf32>
    %266 = vector.extract_strided_slice %151 {offsets = [0, 18], sizes = [4, 256], strides = [1, 1]} : vector<4x290xbf16> to vector<4x256xbf16>
    %267 = vector.broadcast %1 : vector<1x256xbf16> to vector<4x256xbf16>
    %268 = arith.mulf %266, %267 : vector<4x256xbf16>
    %c3_202 = arith.constant 3 : index
    %c1_203 = arith.constant 1 : index
    %c0_204 = arith.constant 0 : index
    %c0_205 = arith.constant 0 : index
    %269 = vector.load %arg2[%c3_202, %c1_203, %c0_204, %c0_205] : memref<4x4x8x4xbf16, #tpu.memory_space<vmem>>, vector<1x1x8x4xbf16>
    %270 = vector.shape_cast %269 : vector<1x1x8x4xbf16> to vector<8x4xbf16>
    %cst_206 = arith.constant dense<0.000000e+00> : vector<8x256xf32>
    %271 = tpu.matmul %270, %268, %cst_206 {dimension_numbers = #tpu.dot_dimension_numbers<[1], [0], [0], [1], [0, 0, 1, 1], [], []>} : vector<8x4xbf16>, vector<4x256xbf16>, vector<8x256xf32> -> vector<8x256xf32>
    %272 = arith.addf %265, %271 : vector<8x256xf32>
    %273 = vector.extract_strided_slice %151 {offsets = [0, 33], sizes = [4, 256], strides = [1, 1]} : vector<4x290xbf16> to vector<4x256xbf16>
    %c3_207 = arith.constant 3 : index
    %c2_208 = arith.constant 2 : index
    %c0_209 = arith.constant 0 : index
    %c0_210 = arith.constant 0 : index
    %274 = vector.load %arg2[%c3_207, %c2_208, %c0_209, %c0_210] : memref<4x4x8x4xbf16, #tpu.memory_space<vmem>>, vector<1x1x8x4xbf16>
    %275 = vector.shape_cast %274 : vector<1x1x8x4xbf16> to vector<8x4xbf16>
    %cst_211 = arith.constant dense<0.000000e+00> : vector<8x256xf32>
    %276 = tpu.matmul %275, %273, %cst_211 {dimension_numbers = #tpu.dot_dimension_numbers<[1], [0], [0], [1], [0, 0, 1, 1], [], []>} : vector<8x4xbf16>, vector<4x256xbf16>, vector<8x256xf32> -> vector<8x256xf32>
    %277 = arith.addf %272, %276 : vector<8x256xf32>
    %278 = vector.extract_strided_slice %151 {offsets = [0, 34], sizes = [4, 256], strides = [1, 1]} : vector<4x290xbf16> to vector<4x256xbf16>
    %279 = vector.broadcast %1 : vector<1x256xbf16> to vector<4x256xbf16>
    %280 = arith.mulf %278, %279 : vector<4x256xbf16>
    %c3_212 = arith.constant 3 : index
    %c3_213 = arith.constant 3 : index
    %c0_214 = arith.constant 0 : index
    %c0_215 = arith.constant 0 : index
    %281 = vector.load %arg2[%c3_212, %c3_213, %c0_214, %c0_215] : memref<4x4x8x4xbf16, #tpu.memory_space<vmem>>, vector<1x1x8x4xbf16>
    %282 = vector.shape_cast %281 : vector<1x1x8x4xbf16> to vector<8x4xbf16>
    %cst_216 = arith.constant dense<0.000000e+00> : vector<8x256xf32>
    %283 = tpu.matmul %282, %280, %cst_216 {dimension_numbers = #tpu.dot_dimension_numbers<[1], [0], [0], [1], [0, 0, 1, 1], [], []>} : vector<8x4xbf16>, vector<4x256xbf16>, vector<8x256xf32> -> vector<8x256xf32>
    %284 = arith.addf %277, %283 : vector<8x256xf32>
    %285 = arith.truncf %284 : vector<8x256xf32> to vector<8x256xbf16>
    %c1_217 = arith.constant 1 : index
    %c3_218 = arith.constant 3 : index
    %c0_219 = arith.constant 0 : index
    %c0_220 = arith.constant 0 : index
    %286 = vector.load %arg4[%c1_217, %c3_218, %c0_219, %c0_220] : memref<2x4x8x256xbf16, #tpu.memory_space<vmem>>, vector<1x1x8x256xbf16>
    %287 = vector.shape_cast %286 : vector<1x1x8x256xbf16> to vector<8x256xbf16>
    %288 = vector.shape_cast %285 : vector<8x256xbf16> to vector<1x1x8x256xbf16>
    tpu.vector_store %arg4[%c1_217, %c3_218, %c0_219, %c0_220], %288 {strides = array<i32>} : memref<2x4x8x256xbf16, #tpu.memory_space<vmem>>, vector<1x1x8x256xbf16>,
    %cst_221 = arith.constant dense<0.000000e+00> : vector<8xf32>
    %289 = vector.multi_reduction <add>, %284, %cst_221 [1] : vector<8x256xf32> to vector<8xf32>
    %290 = vector.shape_cast %289 : vector<8xf32> to vector<8x1xf32>
    %291 = arith.addf %255, %290 : vector<8x1xf32>
    %292 = arith.mulf %284, %284 : vector<8x256xf32>
    %cst_222 = arith.constant dense<0.000000e+00> : vector<8xf32>
    %293 = vector.multi_reduction <add>, %292, %cst_222 [1] : vector<8x256xf32> to vector<8xf32>
    %294 = vector.shape_cast %293 : vector<8xf32> to vector<8x1xf32>
    %295 = arith.addf %259, %294 : vector<8x1xf32>
    %c0_223 = arith.constant 0 : index
    %c0_224 = arith.constant 0 : index
    %c0_225 = arith.constant 0 : index
    %296 = vector.load %arg5[%c0_223, %c0_224, %c0_225] : memref<1x8x1xf32, #tpu.memory_space<vmem>>, vector<1x8x1xf32>
    %297 = vector.shape_cast %296 : vector<1x8x1xf32> to vector<8x1xf32>
    %298 = vector.shape_cast %291 : vector<8x1xf32> to vector<1x8x1xf32>
    tpu.vector_store %arg5[%c0_223, %c0_224, %c0_225], %298 {strides = array<i32>} : memref<1x8x1xf32, #tpu.memory_space<vmem>>, vector<1x8x1xf32>,
    %c0_226 = arith.constant 0 : index
    %c0_227 = arith.constant 0 : index
    %c0_228 = arith.constant 0 : index
    %299 = vector.load %arg6[%c0_226, %c0_227, %c0_228] : memref<1x8x1xf32, #tpu.memory_space<vmem>>, vector<1x8x1xf32>
    %300 = vector.shape_cast %299 : vector<1x8x1xf32> to vector<8x1xf32>
    %301 = vector.shape_cast %295 : vector<8x1xf32> to vector<1x8x1xf32>
    tpu.vector_store %arg6[%c0_226, %c0_227, %c0_228], %301 {strides = array<i32>} : memref<1x8x1xf32, #tpu.memory_space<vmem>>, vector<1x8x1xf32>,
    return
  }
  func.func @transform_0(%arg0: i32) -> (i32, i32, i32) {
    %c0_i32 = arith.constant 0 : i32
    %c0_i32_0 = arith.constant 0 : i32
    %c0_i32_1 = arith.constant 0 : i32
    return %arg0, %c0_i32, %c0_i32_0 : i32, i32, i32
  }
  func.func @transform_1(%arg0: i32) -> (i32, i32, i32, i32) {
    %c0_i32 = arith.constant 0 : i32
    %c0_i32_0 = arith.constant 0 : i32
    %c0_i32_1 = arith.constant 0 : i32
    %c0_i32_2 = arith.constant 0 : i32
    %c0_i32_3 = arith.constant 0 : i32
    return %c0_i32, %c0_i32_0, %c0_i32_1, %c0_i32_2 : i32, i32, i32, i32
  }
  func.func @transform_2(%arg0: i32) -> (i32, i32) {
    %c0_i32 = arith.constant 0 : i32
    %c0_i32_0 = arith.constant 0 : i32
    %c0_i32_1 = arith.constant 0 : i32
    return %c0_i32, %c0_i32_0 : i32, i32
  }
  func.func @transform_3(%arg0: i32) -> (i32, i32, i32, i32) {
    %c0_i32 = arith.constant 0 : i32
    %c0_i32_0 = arith.constant 0 : i32
    %c0_i32_1 = arith.constant 0 : i32
    %c0_i32_2 = arith.constant 0 : i32
    return %arg0, %c0_i32, %c0_i32_0, %c0_i32_1 : i32, i32, i32, i32
  }
  func.func @transform_4(%arg0: i32) -> (i32, i32, i32) {
    %c0_i32 = arith.constant 0 : i32
    %c0_i32_0 = arith.constant 0 : i32
    %c0_i32_1 = arith.constant 0 : i32
    return %arg0, %c0_i32, %c0_i32_0 : i32, i32, i32
  }
  func.func @transform_5(%arg0: i32) -> (i32, i32, i32) {
    %c0_i32 = arith.constant 0 : i32
    %c0_i32_0 = arith.constant 0 : i32
    %c0_i32_1 = arith.constant 0 : i32
    return %arg0, %c0_i32, %c0_i32_0 : i32, i32, i32
  }
}

</mosaic_0001>

<bundles_post_ra>
// kernel: dcgan_upconv_forward.3
= control target key start
LH: loop header
LB: loop body
LE: loop exit
PB: predicated region body
PF: predicated region fallthrough
CT: control target
= control target key end

     0   :  { %v224_v0 = vmov 0   ;;  %s315_s1 = inlined_call_operand.vmem [shape: f32[8,1], index: 1, kind: input, shape index: {}]   ;;  %s316_s2 = inlined_call_operand.vmem [shape: f32[8,1], index: 2, kind: input, shape index: {}]   ;;  %s317_s0 = inlined_call_operand.vmem [shape: bf16[2,4,8,256], index: 0, kind: input, shape index: {}, may-alias: {0,3}]   ;;  %s318_s3 = inlined_call_operand.vmem [shape: bf16[2,4,8,256], index: 3, kind: output, shape index: {}, may-alias: {0,3}]  }
   0x1   :  { %223 = vset.pattern.permute.xlu0 %v224_v0  ;;  %v38_v1 = vld [vmem:[%s315_s1] sm:$0xff]  ;;  %v15_v4 = vld [vmem:[%s317_s0 + $0x8] sm:$0xff]  ;;  %v16_v5 = vld [vmem:[%s317_s0 + $0x10] sm:$0xff] }
   0x2   :  { %41 = vperm.xlu0 %223, %v38_v1   ;;  %v60_v2 = vld [vmem:[%s316_s2] sm:$0xff]  ;;  %v17_v6 = vld [vmem:[%s317_s0 + $0x18] sm:$0xff]  ;;  %v19_v8 = vld [vmem:[%s317_s0 + $0x28] sm:$0xff]  ;;  %v24_v13 = vunpack.c.l.bf16 %v15_v4  ;;  %v25_v14 = vunpack.c.h.bf16 %v15_v4  ;;  %v26_v15 = vunpack.c.l.bf16 %v16_v5  ;;  %v27_v16 = vunpack.c.h.bf16 %v16_v5 }
   0x3   :  { %v14_v3 = vld [vmem:[%s317_s0] sm:$0xff]  ;;  %v20_v9 = vld [vmem:[%s317_s0 + $0x30] sm:$0xff]  ;;  %v21_v10 = vld [vmem:[%s317_s0 + $0x38] sm:$0xff]  ;;  %v28_v17 = vunpack.c.l.bf16 %v17_v6  ;;  %v29_v18 = vunpack.c.h.bf16 %v17_v6  ;;  %v32_v21 = vunpack.c.l.bf16 %v19_v8  ;;  %v33_v22 = vunpack.c.h.bf16 %v19_v8 }
   0x4   :  { %v18_v7 = vld [vmem:[%s317_s0 + $0x20] sm:$0xff]  ;;  %v22_v11 = vunpack.c.l.bf16 %v14_v3  ;;  %v23_v12 = vunpack.c.h.bf16 %v14_v3  ;;  %v34_v24 = vunpack.c.l.bf16 %v20_v9  ;;  %v35_v25 = vunpack.c.h.bf16 %v20_v9 }
   0x5   :  { %v30_v19 = vunpack.c.l.bf16 %v18_v7  ;;  %v31_v20 = vunpack.c.h.bf16 %v18_v7  ;;  %v36_v26 = vunpack.c.l.bf16 %v21_v10  ;;  %v37_v27 = vunpack.c.h.bf16 %v21_v10 }
   0x6   :  { %63 = vperm.xlu0 %223, %v60_v2  }
  0x81   :  { %v42_v23 = vpop.permute.xlu0 %41 }
  0x82   :  { %v44_v28 = vmul.f32 %v42_v23, %v22_v11  ;;  %v45_v29 = vmul.f32 %v42_v23, %v23_v12  ;;  %v46_v30 = vmul.f32 %v42_v23, %v24_v13  ;;  %v47_v31 = vmul.f32 %v42_v23, %v25_v14 }
  0x83   :  { %v48_v32 = vmul.f32 %v42_v23, %v26_v15  ;;  %v49_v33 = vmul.f32 %v42_v23, %v27_v16  ;;  %v50_v34 = vmul.f32 %v42_v23, %v28_v17  ;;  %v51_v35 = vmul.f32 %v42_v23, %v29_v18 }
  0x84   :  { %v52_v36 = vmul.f32 %v42_v23, %v30_v19  ;;  %v53_v37 = vmul.f32 %v42_v23, %v31_v20  ;;  %v54_v38 = vmul.f32 %v42_v23, %v32_v21  ;;  %v55_v39 = vmul.f32 %v42_v23, %v33_v22 }
  0x85   :  { %v64_v40 = vpop.permute.xlu0 %63  ;;  %v56_v41 = vmul.f32 %v42_v23, %v34_v24  ;;  %v57_v42 = vmul.f32 %v42_v23, %v35_v25  ;;  %v58_v43 = vmul.f32 %v42_v23, %v36_v26  ;;  %v59_v44 = vmul.f32 %v42_v23, %v37_v27 }
  0x86   :  { %v66_v45 = vadd.f32 %v64_v40, %v44_v28  ;;  %v67_v46 = vadd.f32 %v64_v40, %v45_v29  ;;  %v68_v47 = vadd.f32 %v64_v40, %v46_v30  ;;  %v69_v48 = vadd.f32 %v64_v40, %v47_v31 }
  0x87   :  { %v70_v49 = vadd.f32 %v64_v40, %v48_v32  ;;  %v71_v50 = vadd.f32 %v64_v40, %v49_v33  ;;  %v72_v51 = vadd.f32 %v64_v40, %v50_v34  ;;  %v73_v52 = vadd.f32 %v64_v40, %v51_v35 }
  0x88   :  { %v74_v53 = vadd.f32 %v64_v40, %v52_v36  ;;  %v75_v54 = vadd.f32 %v64_v40, %v53_v37  ;;  %v76_v55 = vadd.f32 %v64_v40, %v54_v38  ;;  %v77_v56 = vadd.f32 %v64_v40, %v55_v39 }
  0x89   :  { %v78_v57 = vadd.f32 %v64_v40, %v56_v41  ;;  %v79_v58 = vadd.f32 %v64_v40, %v57_v42  ;;  %v80_v59 = vadd.f32 %v64_v40, %v58_v43  ;;  %v81_v60 = vadd.f32 %v64_v40, %v59_v44 }
  0x8a   :  { %vm82_vm0 = vcmp.ge.f32.partialorder %v66_v45, 0.0  ;;  %vm83_vm1 = vcmp.ge.f32.partialorder %v67_v46, 0.0  ;;  %vm84_vm2 = vcmp.ge.f32.partialorder %v68_v47, 0.0  ;;  %vm85_vm3 = vcmp.ge.f32.partialorder %v69_v48, 0.0 }
  0x8b   :  { %vm86_vm4 = vcmp.ge.f32.partialorder %v70_v49, 0.0  ;;  %vm87_vm5 = vcmp.ge.f32.partialorder %v71_v50, 0.0  ;;  %vm88_vm6 = vcmp.ge.f32.partialorder %v72_v51, 0.0  ;;  %vm89_vm7 = vcmp.ge.f32.partialorder %v73_v52, 0.0 }
  0x8c   :  { %vm90_vm8 = vcmp.ge.f32.partialorder %v74_v53, 0.0  ;;  %vm91_vm9 = vcmp.ge.f32.partialorder %v75_v54, 0.0  ;;  %vm92_vm10 = vcmp.ge.f32.partialorder %v76_v55, 0.0  ;;  %vm93_vm11 = vcmp.ge.f32.partialorder %v77_v56, 0.0 }
  0x8d   :  { %vm94_vm12 = vcmp.ge.f32.partialorder %v78_v57, 0.0  ;;  %vm95_vm13 = vcmp.ge.f32.partialorder %v79_v58, 0.0  ;;  %vm96_vm14 = vcmp.ge.f32.partialorder %v80_v59, 0.0  ;;  %vm97_vm15 = vcmp.ge.f32.partialorder %v81_v60, 0.0 }
  0x8e   :  { %v98_v61 = vmul.f32 0.2, %v66_v45  ;;  %v99_v62 = vmul.f32 0.2, %v67_v46  ;;  %v100_v63 = vmul.f32 0.2, %v68_v47 }
  0x8f   :  { %v101_v0 = vmul.f32 0.2, %v69_v48  ;;  %v102_v1 = vmul.f32 0.2, %v70_v49  ;;  %v103_v2 = vmul.f32 0.2, %v71_v50 }
  0x90   :  { %v104_v3 = vmul.f32 0.2, %v72_v51  ;;  %v105_v4 = vmul.f32 0.2, %v73_v52  ;;  %v106_v5 = vmul.f32 0.2, %v74_v53  ;;  %v114_v6 = vsel %vm82_vm0, %v66_v45, %v98_v61 }
  0x91   :  { %v107_v7 = vmul.f32 0.2, %v75_v54  ;;  %v108_v8 = vmul.f32 0.2, %v76_v55  ;;  %v109_v9 = vmul.f32 0.2, %v77_v56  ;;  %v115_v10 = vsel %vm83_vm1, %v67_v46, %v99_v62 }
  0x92   :  { %v110_v11 = vmul.f32 0.2, %v78_v57  ;;  %v111_v12 = vmul.f32 0.2, %v79_v58  ;;  %v112_v13 = vmul.f32 0.2, %v80_v59  ;;  %v116_v14 = vsel %vm84_vm2, %v68_v47, %v100_v63 }
  0x93   :  { %v113_v15 = vmul.f32 0.2, %v81_v60  ;;  %v117_v16 = vsel %vm85_vm3, %v69_v48, %v101_v0  ;;  %v118_v17 = vsel %vm86_vm4, %v70_v49, %v102_v1  ;;  %v119_v18 = vsel %vm87_vm5, %v71_v50, %v103_v2 }
  0x94   :  { %v120_v19 = vsel %vm88_vm6, %v72_v51, %v104_v3  ;;  %v121_v20 = vsel %vm89_vm7, %v73_v52, %v105_v4  ;;  %v122_v21 = vsel %vm90_vm8, %v74_v53, %v106_v5  ;;  %v123_v22 = vsel %vm91_vm9, %v75_v54, %v107_v7 }
  0x95   :  { %v124_v23 = vsel %vm92_vm10, %v76_v55, %v108_v8  ;;  %v125_v24 = vsel %vm93_vm11, %v77_v56, %v109_v9  ;;  %v126_v25 = vsel %vm94_vm12, %v78_v57, %v110_v11  ;;  %v127_v26 = vsel %vm95_vm13, %v79_v58, %v111_v12 }
  0x96   :  { %v128_v27 = vsel %vm96_vm14, %v80_v59, %v112_v13  ;;  %v129_v28 = vsel %vm97_vm15, %v81_v60, %v113_v15  ;;  %v214_v29 = vpack.c.bf16 %v115_v10, %v114_v6  ;;  %v215_v30 = vpack.c.bf16 %v117_v16, %v116_v14 }
  0x97   :  { %v216_v31 = vpack.c.bf16 %v119_v18, %v118_v17  ;;  %v217_v32 = vpack.c.bf16 %v121_v20, %v120_v19  ;;  %v218_v33 = vpack.c.bf16 %v123_v22, %v122_v21  ;;  %v219_v34 = vpack.c.bf16 %v125_v24, %v124_v23 }
  0x98   :  { %v220_v35 = vpack.c.bf16 %v127_v26, %v126_v25  ;;  %v221_v36 = vpack.c.bf16 %v129_v28, %v128_v27  ;;  %194 = vst [vmem:[%s318_s3] sm:$0xff] %v214_v29  ;;  %195 = vst [vmem:[%s318_s3 + $0x8] sm:$0xff] %v215_v30 }
  0x99   :  { %196 = vst [vmem:[%s318_s3 + $0x10] sm:$0xff] %v216_v31  ;;  %197 = vst [vmem:[%s318_s3 + $0x18] sm:$0xff] %v217_v32 }
  0x9a   :  { %198 = vst [vmem:[%s318_s3 + $0x20] sm:$0xff] %v218_v33  ;;  %199 = vst [vmem:[%s318_s3 + $0x28] sm:$0xff] %v219_v34 }
  0x9b   :  { %200 = vst [vmem:[%s318_s3 + $0x30] sm:$0xff] %v220_v35  ;;  %201 = vst [vmem:[%s318_s3 + $0x38] sm:$0xff] %v221_v36 }

// kernel: dcgan_upconv_forward.2
= control target key start
LH: loop header
LB: loop body
LE: loop exit
PB: predicated region body
PF: predicated region fallthrough
CT: control target
= control target key end

     0   :  { %v33_v0 = vlaneseq  ;;  %v2498_v2 = vmov 1966171168   ;;  %v2499_v5 = vmov 1983009808   ;;  %s2501_s20 = smov 2   ;;  %s2502_s21 = smov 18   ;;  %s2993_s2 = inlined_call_operand.vmem [shape: bf16[2,256], index: 2, kind: input, shape index: {}]   ;;  %s2994_s0 = inlined_call_operand.vmem [shape: bf16[2,4,290], index: 0, kind: input, shape index: {}]   ;;  %s2995_s1 = inlined_call_operand.vmem [shape: bf16[4,4,8,4], index: 1, kind: input, shape index: {}]   ;;  %s2996_s3 = inlined_call_operand.vmem [shape: bf16[2,4,8,256], index: 3, kind: output, shape index: {0}]   ;;  %s2997_s4 = inlined_call_operand.vmem [shape: f32[1,8,1], index: 4, kind: output, shape index: {1}]   ;;  %s2998_s5 = inlined_call_operand.vmem [shape: f32[1,8,1], index: 5, kind: output, shape index: {2}]  }
   0x1   :  { %v2265_v1 = vld.sshfl [vmem:[%s2993_s2] sm:$0x11 pattern:$0x75316420]  ;;  %v31_v3 = vunpack.c.l.s4 %v2498_v2  ;;  %v62_v6 = vunpack.c.l.s4 %v2499_v5  ;;  %s2500_s2 = smov 16   ;;  %vm71_vm0 = vcmask 130048  }
   0x2   :  { %v34_v4 = vshrl.u32 %v33_v0, 7  ;;  %v29_v7 = vcombine.high %v2265_v1, %v2265_v1  ;;  %v2557_v30 = vld [vmem:[%s2994_s0] sm:$0x3f]  ;;  %v2503_v33 = vmov 0   ;;  %vm407_vm1 = vcmask 146432   ;;  %s2504_s24 = smov 112  }
   0x3   :  { %v32_v8 = vunpack.c.0.s8 %v31_v3  ;;  %v63_v10 = vunpack.c.0.s8 %v62_v6  ;;  %146 = vmatprep.mubr.bf16.mxu0 %v2503_v33  ;;  %480 = vmatprep.mubr.bf16.mxu1 %v2503_v33  ;;  %s2505_s25 = smov 110   ;;  %v156_v48 = vcombine.high %v2557_v30, %v2557_v30  ;;  %s2506_s26 = smov 111   ;;  %vm584_vm2 = vcmask 15360   ;;  %v2266_v2 = vld [vmem:[%s2995_s1 + $0x4] sm:$0xf] }
   0x4   :  { %v49_v13 = vsub.s32 0, %v34_v4  ;;  %s2507_s27 = smov 32   ;;  %s2508_s28 = smov 34   ;;  %vm100_vm3 = vcmask 916480   ;;  %vm107_vm4 = vcmask 1041408   ;;  %vm436_vm5 = vcmask 900096  }
   0x5   :  { %v35_v9 = vsub.s32 %v32_v8, %v34_v4  ;;  %v2547_v18 = vsub.s32 %v63_v10, %v34_v4  ;;  %s2509_s29 = smov 127   ;;  %s2510_s30 = smov 126   ;;  %vm103_vm6 = vcmask 31744   ;;  %vm178_vm7 = vcmask 908288  }
   0x6   :  { %s2511_s6 = smov 95   ;;  %vm846_vm8 = vcmask 261120   ;;  %vm1093_vm9 = vcmask 277504   ;;  %vm239_vm10 = vcmask 1039360   ;;  %vm613_vm11 = vcmask 1031168   ;;  %s2513_s19 = smov 94  }
   0x7   :  { %v36_v11 = vrot.slane %v2265_v1, %v35_v9  ;;  %v43_v12 = vrot.slane %v29_v7, %v35_v9  ;;  %v163_v46 = vrot.slane %v2557_v30, %v2547_v18  ;;  %v170_v51 = vrot.slane %v156_v48, %v2547_v18  ;;  %v2279_v9 = vld [vmem:[%s2995_s1 + $0x14] sm:$0xf]  ;;  %v2271_v48 = vld [vmem:[%s2995_s1 + $0x8] sm:$0xf] }
   0x8   :  { %vm788_vm12 = vcmask 777216   ;;  %vm875_vm13 = vcmask 785408   ;;  %vm1122_vm14 = vcmask 769024   ;;  %vm2250_vm15 = vcmask 7168  }
   0x9   :  { %v45_v14 = vpack.i.b16 %v36_v11, %v36_v11  ;;  %v52_v15 = vpack.i.b16 %v43_v12, %v43_v12  ;;  %v380_v16 = vshrl.u32 %v36_v11, 16  ;;  %v387_v17 = vshrl.u32 %v43_v12, 16 }
   0xa   :  { %v171_v49 = vcombine.high %v163_v46, %v163_v46 }
   0xb   :  { %v50_v19 = vrot.slane %v45_v14, %v49_v13  ;;  %v57_v20 = vrot.slane %v52_v15, %v49_v13  ;;  %v381_v21 = vpack.i.b16 %v380_v16, %v380_v16  ;;  %v388_v22 = vpack.i.b16 %v387_v17, %v387_v17 }
   0xd   :  { %v60_v23 = vcombine.low %v50_v19, %v57_v20  ;;  %v386_v24 = vrot.slane %v381_v21, %v49_v13  ;;  %v393_v25 = vrot.slane %v388_v22, %v49_v13  ;;  %v20_v19 = vld [vmem:[%s2995_s1] sm:$0xf] }
   0xf   :  { %v2550_v26 = vrot.slane %v60_v23, %v2547_v18  ;;  %v396_v27 = vcombine.low %v386_v24, %v393_v25 }
  0x11   :  { %68 = vrot.lane.b32.xlu0 %v2550_v26, %s2500_s2  ;;  %v403_v28 = vrot.slane %v396_v27, %v2547_v18  ;;  %v295_v16 = vmul.bf16 %v2550_v26, %v2557_v30  ;;  %v2661_v27 = vld [vmem:[%s2994_s0 + $0x6] sm:$0x3f]  ;;  %s2512_s0 = smov 96  }
  0x13   :  { %581 = vrot.lane.b32.xlu1 %v403_v28, %s2501_s20  ;;  %v305_v25 = vrot.slane %v295_v16, %v2547_v18 }
  0x15   :  { %404 = vrot.lane.b32.xlu0 %v403_v28, %s2502_s21 }
  0x83   :  { %v69_v29 = vpop.permute.xlu0 %68 }
  0x84   :  { %v70_v31 = vrot.slane %v69_v29, 6 }
  0x85   :  { %v582_v50 = vpop.permute.xlu1 %581 }
  0x86   :  { %v2559_v32 = vsel %vm71_vm0, %v70_v31, %v69_v29  ;;  %v583_v52 = vrot.slane %v582_v50, 6 }
  0x87   :  { %v74_v34 = vmul.bf16 %v2559_v32, %v2557_v30  ;;  %v405_v35 = vpop.permute.xlu0 %404 }
  0x88   :  { %v406_v36 = vrot.slane %v405_v35, 6  ;;  %v2587_v53 = vsel %vm584_vm2, %v583_v52, %v582_v50 }
  0x89   :  { %v78_v37 = vcombine.high %v74_v34, %v74_v34  ;;  %v85_v38 = vrot.slane %v74_v34, %v2547_v18  ;;  %v587_v54 = vmul.bf16 %v2587_v53, %v2557_v30  ;;  %v1665_v16 = vmul.bf16 %v2661_v27, %v2587_v53 }
  0x8a   :  { %v2566_v39 = vsel %vm407_vm1, %v406_v36, %v405_v35  ;;  %v2278_v36 = vld [vmem:[%s2995_s1 + $0x10] sm:$0xf] }
  0x8b   :  { %v410_v40 = vmul.bf16 %v2566_v39, %v2557_v30  ;;  %94 = vrot.lane.b32.xlu1 %v85_v38, %s2504_s24  ;;  %v93_v41 = vcombine.high %v85_v38, %v85_v38  ;;  %v92_v42 = vrot.slane %v78_v37, %v2547_v18  ;;  %v591_v55 = vcombine.high %v587_v54, %v587_v54 }
  0x8c   :  { %v598_v56 = vrot.slane %v587_v54, %v2547_v18  ;;  %v1675_v53 = vrot.slane %v1665_v16, %v2547_v18 }
  0x8d   :  { %96 = vrot.lane.b32.xlu0 %v93_v41, %s2504_s24  ;;  %v421_v43 = vrot.slane %v410_v40, %v2547_v18  ;;  %v414_v44 = vcombine.high %v410_v40, %v410_v40  ;;  %v605_v58 = vrot.slane %v591_v55, %v2547_v18  ;;  %v306_v40 = vcombine.high %v305_v25, %v305_v25 }
  0x8e   :  { %v606_v57 = vcombine.high %v598_v56, %v598_v56  ;;  %v1200_v41 = vmul.bf16 %v2661_v27, %v2559_v32 }
  0x8f   :  { %98 = vrot.lane.b32.xlu1 %v92_v42, %s2504_s24  ;;  %v429_v45 = vcombine.high %v421_v43, %v421_v43  ;;  %v428_v47 = vrot.slane %v414_v44, %v2547_v18 }
  0x91   :  { %430 = vrot.lane.b32.xlu0 %v421_v43, %s2505_s25 }
  0x93   :  { %432 = vrot.lane.b32.xlu1 %v429_v45, %s2505_s25 }
  0x95   :  { %434 = vrot.lane.b32.xlu0 %v428_v47, %s2505_s25  ;;  %v1210_v47 = vrot.slane %v1200_v41, %v2547_v18 }
  0x97   :  { %172 = vrot.lane.b32.xlu1 %v163_v46, %s2506_s26  ;;  %v1218_v54 = vcombine.high %v1210_v47, %v1210_v47 }
  0x99   :  { %174 = vrot.lane.b32.xlu0 %v171_v49, %s2506_s26 }
  0x9b   :  { %176 = vrot.lane.b32.xlu1 %v170_v51, %s2506_s26 }
  0x9d   :  { %843 = vrot.lane.b32.xlu0 %v2550_v26, %s2507_s27 }
  0x9f   :  { %1090 = vrot.lane.b32.xlu1 %v403_v28, %s2508_s28 }
  0xa1   :  { %233 = vrot.lane.b32.xlu0 %v163_v46, %s2509_s29 }
  0xa3   :  { %235 = vrot.lane.b32.xlu1 %v171_v49, %s2509_s29 }
  0xa5   :  { %237 = vrot.lane.b32.xlu0 %v170_v51, %s2509_s29 }
  0xa7   :  { %607 = vrot.lane.b32.xlu1 %v598_v56, %s2510_s30  ;;  %v1203_v56 = vcombine.high %v1200_v41, %v1200_v41 }
  0xa9   :  { %609 = vrot.lane.b32.xlu0 %v606_v57, %s2510_s30  ;;  %v1497_v57 = vmul.bf16 %v2661_v27, %v2566_v39  ;;  %v1217_v39 = vrot.slane %v1203_v56, %v2547_v18 }
  0xab   :  { %611 = vrot.lane.b32.xlu1 %v605_v58, %s2510_s30 }
  0xad   :  { %782 = vrot.lane.b32.xlu0 %v163_v46, %s2511_s6 }
  0xaf   :  { %784 = vrot.lane.b32.xlu1 %v171_v49, %s2511_s6  ;;  %v311_v49 = vsel %vm107_vm4, %v305_v25, 0 }
  0xb1   :  { %786 = vrot.lane.b32.xlu0 %v170_v51, %s2511_s6 }
  0xfd   :  { %v95_v59 = vpop.permute.xlu1 %94 }
  0xff   :  { %v97_v60 = vpop.permute.xlu0 %96 }
 0x100   :  { %v101_v61 = vsel %vm100_vm3, %v95_v59, %v97_v60  ;;  %v2284_v59 = vld [vmem:[%s2995_s1 + $0x18] sm:$0xf] }
 0x101   :  { %v99_v62 = vpop.permute.xlu1 %98  ;;  %v2610_v1 = vsel %vm107_vm4, %v101_v61, 0 }
 0x102   :  { %v2605_v63 = vsel %vm100_vm3, %v97_v60, %v99_v62  ;;  %v1507_v62 = vrot.slane %v1497_v57, %v2547_v18 }
 0x103   :  { %v431_v0 = vpop.permute.xlu0 %430  ;;  %2267 = vmatprep.subr.msk.bf16.mxu0 %vm107_vm4, %v2605_v63 }
 0x104   :  { %115 = vmatpush1.bf16.msra.mxu0 %v2610_v1 }
 0x105   :  { %v433_v3 = vpop.permute.xlu1 %432 }
 0x106   :  { %v437_v4 = vsel %vm436_vm5, %v431_v0, %v433_v3  ;;  %v2274_v0 = vld [vmem:[%s2995_s1 + $0xc] sm:$0xf] }
 0x107   :  { %v435_v5 = vpop.permute.xlu0 %434  ;;  %2268 = vmatmul.mubr.msk.bf16.vlgmr.msra.gmra.mrb[0].mxu0 %vm103_vm6, %v2266_v2  ;;  %v2625_v8 = vsel %vm107_vm4, %v437_v4, 0  ;;  %v1515_v2 = vcombine.high %v1507_v62, %v1507_v62 }
 0x108   :  { %v2619_v6 = vsel %vm436_vm5, %v433_v3, %v435_v5  ;;  %222 = vmatprep.mubr.bf16.mxu0 %v2503_v33  ;;  %v1285_v3 = vrot.slane %v2661_v27, %v2547_v18 }
 0x109   :  { %2280 = vmatprep.subr.msk.bf16.mxu1 %vm107_vm4, %v2619_v6  ;;  %v173_v7 = vpop.permute.xlu1 %172 }
 0x10a   :  { %449 = vmatpush1.bf16.msra.mxu1 %v2625_v8 }
 0x10b   :  { %v175_v10 = vpop.permute.xlu0 %174 }
 0x10c   :  { %v179_v11 = vsel %vm178_vm7, %v173_v7, %v175_v10  ;;  %v1293_v7 = vcombine.high %v1285_v3, %v1285_v3 }
 0x10d   :  { %2281 = vmatmul.mubr.msk.bf16.vlgmr.msra.gmra.mrb[0].mxu1 %vm103_vm6, %v2279_v9  ;;  %v177_v12 = vpop.permute.xlu1 %176  ;;  %v2638_v14 = vsel %vm107_vm4, %v179_v11, 0  ;;  %v2287_v9 = vld [vmem:[%s2995_s1 + $0x1c] sm:$0xf] }
 0x10e   :  { %v2634_v13 = vsel %vm178_vm7, %v175_v10, %v177_v12  ;;  %524 = vmatprep.mubr.bf16.mxu1 %v2503_v33  ;;  %v2293_v10 = vld [vmem:[%s2995_s1 + $0x24] sm:$0xf] }
 0x10f   :  { %v844_v15 = vpop.permute.xlu0 %843  ;;  %2269 = vmatprep.subr.msk.bf16.mxu0 %vm107_vm4, %v2634_v13  ;;  %2282 = vmatprep.subr.msk.bf16.mxu1 %vm107_vm4, %v2634_v13 }
 0x110   :  { %v845_v17 = vrot.slane %v844_v15, 6  ;;  %191 = vmatpush1.bf16.msra.mxu0 %v2638_v14  ;;  %493 = vmatpush1.bf16.msra.mxu1 %v2638_v14 }
 0x111   :  { %v1091_v20 = vpop.permute.xlu1 %1090 }
 0x112   :  { %v2651_v21 = vsel %vm846_vm8, %v845_v17, %v844_v15  ;;  %v1092_v22 = vrot.slane %v1091_v20, 6 }
 0x113   :  { %v849_v23 = vmul.bf16 %v2651_v21, %v2557_v30  ;;  %2270 = vmatmul.mubr.msk.bf16.vlgmr.msra.gmra.mrb[0].mxu0 %vm103_vm6, %v20_v19  ;;  %v234_v24 = vpop.permute.xlu0 %233  ;;  %v1683_v19 = vcombine.high %v1675_v53, %v1675_v53 }
 0x114   :  { %283 = vmatprep.mubr.bf16.mxu0 %v2503_v33  ;;  %v2663_v28 = vsel %vm1093_vm9, %v1092_v22, %v1091_v20  ;;  %v2292_v20 = vld [vmem:[%s2995_s1 + $0x20] sm:$0xf] }
 0x115   :  { %v236_v29 = vpop.permute.xlu1 %235  ;;  %v853_v31 = vcombine.high %v849_v23, %v849_v23  ;;  %v860_v34 = vrot.slane %v849_v23, %v2547_v18  ;;  %v1096_v42 = vmul.bf16 %v2663_v28, %v2557_v30 }
 0x116   :  { %v240_v35 = vsel %vm239_vm10, %v234_v24, %v236_v29  ;;  %v2306_v24 = vld [vmem:[%s2995_s1 + $0x30] sm:$0xf] }
 0x117   :  { %v238_v37 = vpop.permute.xlu0 %237  ;;  %v246_v38 = vsel %vm107_vm4, %v240_v35, 0  ;;  %869 = vrot.lane.b32.xlu1 %v860_v34, %s2512_s0  ;;  %v868_v44 = vcombine.high %v860_v34, %v860_v34  ;;  %v867_v46 = vrot.slane %v853_v31, %v2547_v18  ;;  %v1107_v32 = vrot.slane %v1096_v42, %v2547_v18  ;;  %v2298_v34 = vld [vmem:[%s2995_s1 + $0x28] sm:$0xf] }
 0x118   :  { %v241_v43 = vsel %vm239_vm10, %v236_v29, %v238_v37  ;;  %v1100_v52 = vcombine.high %v1096_v42, %v1096_v42 }
 0x119   :  { %2283 = vmatmul.mubr.msk.bf16.vlgmr.msra.gmra.mrb[0].mxu1 %vm103_vm6, %v2278_v36  ;;  %2272 = vmatprep.subr.msk.bf16.mxu0 %vm107_vm4, %v241_v43  ;;  %v608_v45 = vpop.permute.xlu1 %607  ;;  %v1115_v58 = vcombine.high %v1107_v32, %v1107_v32 }
 0x11a   :  { %871 = vrot.lane.b32.xlu0 %v868_v44, %s2512_s0  ;;  %252 = vmatpush1.bf16.msra.mxu0 %v246_v38  ;;  %v1114_v61 = vrot.slane %v1100_v52, %v2547_v18 }
 0x11b   :  { %2275 = vmatprep.subr.msk.bf16.mxu0 %vm107_vm4, %v306_v40  ;;  %2285 = vmatprep.subr.msk.bf16.mxu1 %vm107_vm4, %v241_v43  ;;  %v610_v30 = vpop.permute.xlu0 %609 }
 0x11c   :  { %873 = vrot.lane.b32.xlu1 %v867_v46, %s2512_s0  ;;  %539 = vmatpush1.bf16.msra.mxu1 %v246_v38  ;;  %v614_v55 = vsel %vm613_vm11, %v608_v45, %v610_v30  ;;  %v2312_v38 = vld [vmem:[%s2995_s1 + $0x38] sm:$0xf] }
 0x11d   :  { %v612_v50 = vpop.permute.xlu1 %611  ;;  %570 = vmatprep.mubr.bf16.mxu1 %v2503_v33  ;;  %v620_v60 = vsel %vm107_vm4, %v614_v55, 0 }
 0x11e   :  { %1116 = vrot.lane.b32.xlu0 %v1107_v32, %s2513_s19  ;;  %v615_v51 = vsel %vm613_vm11, %v610_v30, %v612_v50  ;;  %v2301_v32 = vld [vmem:[%s2995_s1 + $0x2c] sm:$0xf] }
 0x11f   :  { %2273 = vmatmul.mubr.msk.bf16.vlgmr.msra.gmra.mrb[0].mxu0 %vm103_vm6, %v2271_v48  ;;  %2288 = vmatprep.subr.msk.bf16.mxu1 %vm107_vm4, %v615_v51  ;;  %v783_v4 = vpop.permute.xlu0 %782 }
 0x120   :  { %1219 = vrot.lane.b32.xlu1 %v1210_v47, %s2504_s24  ;;  %317 = vmatpush1.bf16.msra.mxu0 %v311_v49 }
 0x121   :  { %2294 = vmatprep.subr.msk.bf16.mxu0 %vm107_vm4, %v2605_v63  ;;  %348 = vmatprep.mubr.bf16.mxu0 %v2503_v33  ;;  %v1500_v63 = vcombine.high %v1497_v57, %v1497_v57  ;;  %v785_v12 = vpop.permute.xlu1 %784 }
 0x122   :  { %1221 = vrot.lane.b32.xlu0 %v1218_v54, %s2504_s24  ;;  %v789_v17 = vsel %vm788_vm12, %v783_v4, %v785_v12  ;;  %v2335_v4 = vld [vmem:[%s2995_s1 + $0x14] sm:$0xf] }
 0x123   :  { %v1514_v5 = vrot.slane %v1500_v63, %v2547_v18  ;;  %v787_v11 = vpop.permute.xlu0 %786  ;;  %v795_v22 = vsel %vm107_vm4, %v789_v17, 0  ;;  %v2334_v17 = vld [vmem:[%s2995_s1 + $0x10] sm:$0xf] }
 0x124   :  { %1118 = vrot.lane.b32.xlu1 %v1115_v58, %s2513_s19  ;;  %v790_v15 = vsel %vm788_vm12, %v785_v12, %v787_v11  ;;  %v2315_v58 = vld [vmem:[%s2995_s1 + $0x3c] sm:$0xf] }
 0x125   :  { %2286 = vmatmul.mubr.msk.bf16.vlgmr.msra.gmra.mrb[0].mxu1 %vm103_vm6, %v2284_v59 }
 0x126   :  { %1120 = vrot.lane.b32.xlu0 %v1114_v61, %s2513_s19  ;;  %626 = vmatpush1.bf16.msra.mxu1 %v620_v60  ;;  %v2321_v61 = vld [vmem:[%s2995_s1 + $0x4] sm:$0xf] }
 0x127   :  { %2308 = vmatprep.subr.msk.bf16.mxu1 %vm107_vm4, %v2619_v6  ;;  %657 = vmatprep.mubr.bf16.mxu1 %v2503_v33  ;;  %v1278_v6 = vcombine.high %v2661_v27, %v2661_v27 }
 0x128   :  { %1223 = vrot.lane.b32.xlu1 %v1217_v39, %s2504_s24 }
 0x12a   :  { %1516 = vrot.lane.b32.xlu0 %v1507_v62, %s2505_s25 }
 0x12b   :  { %2276 = vmatmul.mubr.msk.bf16.vlgmr.msra.gmra.mrb[0].mxu0 %vm103_vm6, %v2274_v0 }
 0x12c   :  { %1518 = vrot.lane.b32.xlu1 %v1515_v2, %s2505_s25  ;;  %696 = vmatpush1.bf16.msra.mxu0 %v2610_v1  ;;  %v1292_v1 = vrot.slane %v1278_v6, %v2547_v18  ;;  %v1413_v6 = vmul.bf16 %v2661_v27, %v2550_v26  ;;  %v1199_v26 = vld [vmem:[%s2995_s1] sm:$0xf] }
 0x12d   :  { %2296 = vmatprep.subr.msk.bf16.mxu0 %vm107_vm4, %v2634_v13  ;;  %727 = vmatprep.mubr.bf16.mxu0 %v2503_v33 }
 0x12e   :  { %1520 = vrot.lane.b32.xlu0 %v1514_v5, %s2505_s25  ;;  %v1422_v12 = vrot.slane %v1413_v6, %v2547_v18 }
 0x130   :  { %1294 = vrot.lane.b32.xlu1 %v1285_v3, %s2506_s26 }
 0x131   :  { %2289 = vmatmul.mubr.msk.bf16.vlgmr.msra.gmra.mrb[0].mxu1 %vm103_vm6, %v2287_v9 }
 0x132   :  { %1296 = vrot.lane.b32.xlu0 %v1293_v7, %s2506_s26  ;;  %958 = vmatpush1.bf16.msra.mxu1 %v2625_v8  ;;  %v2307_v8 = vld [vmem:[%s2995_s1 + $0x34] sm:$0xf] }
 0x133   :  { %2310 = vmatprep.subr.msk.bf16.mxu1 %vm107_vm4, %v2634_v13  ;;  %2295 = vmatmul.mubr.msk.bf16.vlgmr.msra.gmra.mrb[4].mxu0 %vm103_vm6, %v2293_v10  ;;  %v1668_v13 = vcombine.high %v1665_v16, %v1665_v16 }
 0x134   :  { %1298 = vrot.lane.b32.xlu1 %v1292_v1, %s2506_s26  ;;  %740 = vmatpush1.bf16.msra.mxu0 %v2638_v14 }
 0x135   :  { %989 = vmatprep.mubr.bf16.mxu1 %v2503_v33  ;;  %771 = vmatprep.mubr.bf16.mxu0 %v2503_v33  ;;  %v1682_v23 = vrot.slane %v1668_v13, %v2547_v18 }
 0x136   :  { %1353 = vrot.lane.b32.xlu0 %v1285_v3, %s2509_s29  ;;  %2299 = vmatprep.subr.msk.bf16.mxu0 %vm107_vm4, %v790_v15 }
 0x138   :  { %1355 = vrot.lane.b32.xlu1 %v1293_v7, %s2509_s29 }
 0x139   :  { %2309 = vmatmul.mubr.msk.bf16.vlgmr.msra.gmra.mrb[4].mxu1 %vm103_vm6, %v2307_v8 }
 0x13a   :  { %1357 = vrot.lane.b32.xlu0 %v1292_v1, %s2509_s29  ;;  %1002 = vmatpush1.bf16.msra.mxu1 %v2638_v14  ;;  %v1915_v14 = vmul.bf16 %v2661_v27, %v2651_v21  ;;  %v2151_v21 = vmul.bf16 %v2661_v27, %v2663_v28 }
 0x13b   :  { %1033 = vmatprep.mubr.bf16.mxu1 %v2503_v33  ;;  %2313 = vmatprep.subr.msk.bf16.mxu1 %vm107_vm4, %v790_v15 }
 0x13c   :  { %1684 = vrot.lane.b32.xlu1 %v1675_v53, %s2510_s30  ;;  %v1925_v25 = vrot.slane %v1915_v14, %v2547_v18  ;;  %v1918_v29 = vcombine.high %v1915_v14, %v1915_v14  ;;  %v2161_v36 = vrot.slane %v2151_v21, %v2547_v18  ;;  %v2154_v28 = vcombine.high %v2151_v21, %v2151_v21  ;;  %v2329_v21 = vld [vmem:[%s2995_s1 + $0xc] sm:$0xf] }
 0x13d   :  { %v1423_v53 = vcombine.high %v1422_v12, %v1422_v12  ;;  %v1428_v14 = vsel %vm107_vm4, %v1422_v12, 0 }
 0x13e   :  { %1686 = vrot.lane.b32.xlu0 %v1683_v19, %s2510_s30  ;;  %v1933_v31 = vcombine.high %v1925_v25, %v1925_v25  ;;  %v1932_v35 = vrot.slane %v1918_v29, %v2547_v18  ;;  %v2169_v37 = vcombine.high %v2161_v36, %v2161_v36  ;;  %v2168_v40 = vrot.slane %v2154_v28, %v2547_v18 }
 0x13f   :  { %2297 = vmatmul.mubr.msk.bf16.vlgmr.msra.gmra.mrb[4].mxu0 %vm103_vm6, %v2292_v20 }
 0x140   :  { %1688 = vrot.lane.b32.xlu1 %v1682_v23, %s2510_s30  ;;  %801 = vmatpush1.bf16.msra.mxu0 %v795_v22  ;;  %v2326_v23 = vld [vmem:[%s2995_s1 + $0x8] sm:$0xf] }
 0x141   :  { %832 = vmatprep.mubr.bf16.mxu0 %v2503_v33 }
 0x142   :  { %1855 = vrot.lane.b32.xlu0 %v1285_v3, %s2511_s6 }
 0x144   :  { %1857 = vrot.lane.b32.xlu1 %v1293_v7, %s2511_s6 }
 0x145   :  { %2311 = vmatmul.mubr.msk.bf16.vlgmr.msra.gmra.mrb[4].mxu1 %vm103_vm6, %v2306_v24 }
 0x146   :  { %1859 = vrot.lane.b32.xlu0 %v1292_v1, %s2511_s6  ;;  %1048 = vmatpush1.bf16.msra.mxu1 %v795_v22 }
 0x147   :  { %1079 = vmatprep.mubr.bf16.mxu1 %v2503_v33 }
 0x148   :  { %1934 = vrot.lane.b32.xlu1 %v1925_v25, %s2512_s0  ;;  %v2340_v25 = vld [vmem:[%s2995_s1 + $0x18] sm:$0xf] }
 0x14a   :  { %1936 = vrot.lane.b32.xlu0 %v1933_v31, %s2512_s0 }
 0x14b   :  { %2300 = vmatmul.mubr.msk.bf16.vlgmr.msra.gmra.mrb[4].mxu0 %vm103_vm6, %v2298_v34  ;;  %v2343_v34 = vld [vmem:[%s2995_s1 + $0x1c] sm:$0xf] }
 0x14c   :  { %1938 = vrot.lane.b32.xlu1 %v1932_v35, %s2512_s0  ;;  %919 = vmatprep.mubr.bf16.mxu0 %v2503_v33  ;;  %v2349_v35 = vld [vmem:[%s2995_s1 + $0x24] sm:$0xf] }
 0x14e   :  { %2170 = vrot.lane.b32.xlu0 %v2161_v36, %s2513_s19 }
 0x150   :  { %2172 = vrot.lane.b32.xlu1 %v2169_v37, %s2513_s19 }
 0x151   :  { %2314 = vmatmul.mubr.msk.bf16.vlgmr.msra.gmra.mrb[4].mxu1 %vm103_vm6, %v2312_v38  ;;  %v2363_v38 = vld [vmem:[%s2995_s1 + $0x34] sm:$0xf] }
 0x152   :  { %2174 = vrot.lane.b32.xlu0 %v2168_v40, %s2513_s19  ;;  %1166 = vmatprep.mubr.bf16.mxu1 %v2503_v33 }
 0x189   :  { %v870_v41 = vpop.permute.xlu1 %869 }
 0x18c   :  { %v872_v42 = vpop.permute.xlu0 %871 }
 0x18d   :  { %v876_v43 = vsel %vm875_vm13, %v870_v41, %v872_v42 }
 0x18e   :  { %v874_v44 = vpop.permute.xlu1 %873  ;;  %v882_v46 = vsel %vm107_vm4, %v876_v43, 0  ;;  %v2348_v43 = vld [vmem:[%s2995_s1 + $0x20] sm:$0xf] }
 0x18f   :  { %v877_v45 = vsel %vm875_vm13, %v872_v42, %v874_v44 }
 0x190   :  { %v1117_v30 = vpop.permute.xlu0 %1116  ;;  %2302 = vmatprep.subr.msk.bf16.mxu0 %vm107_vm4, %v877_v45 }
 0x191   :  { %888 = vmatpush1.bf16.msra.mxu0 %v882_v46 }
 0x192   :  { %v1220_v47 = vpop.permute.xlu1 %1219 }
 0x194   :  { %v1222_v48 = vpop.permute.xlu0 %1221  ;;  %2303 = vmatmul.mubr.msk.bf16.vlgmr.msra.gmra.mrb[4].mxu0 %vm103_vm6, %v2301_v32  ;;  %v2362_v32 = vld [vmem:[%s2995_s1 + $0x30] sm:$0xf] }
 0x195   :  { %1268 = vmatprep.mubr.bf16.mxu0 %v2503_v33  ;;  %v1225_v52 = vsel %vm100_vm3, %v1220_v47, %v1222_v48 }
 0x196   :  { %v1119_v49 = vpop.permute.xlu1 %1118  ;;  %v2828_v59 = vsel %vm107_vm4, %v1225_v52, 0 }
 0x197   :  { %v1123_v50 = vsel %vm1122_vm14, %v1117_v30, %v1119_v49 }
 0x198   :  { %v1121_v51 = vpop.permute.xlu0 %1120  ;;  %v1129_v55 = vsel %vm107_vm4, %v1123_v50, 0 }
 0x199   :  { %v1124_v54 = vsel %vm1122_vm14, %v1119_v49, %v1121_v51  ;;  %v2354_v51 = vld [vmem:[%s2995_s1 + $0x28] sm:$0xf] }
 0x19a   :  { %2316 = vmatprep.subr.msk.bf16.mxu1 %vm107_vm4, %v1124_v54  ;;  %v1224_v56 = vpop.permute.xlu1 %1223 }
 0x19b   :  { %v1226_v57 = vsel %vm100_vm3, %v1222_v48, %v1224_v56  ;;  %1135 = vmatpush1.bf16.msra.mxu1 %v1129_v55  ;;  %v2368_v55 = vld [vmem:[%s2995_s1 + $0x38] sm:$0xf] }
 0x19c   :  { %v1517_v60 = vpop.permute.xlu0 %1516  ;;  %2322 = vmatprep.subr.msk.bf16.mxu0 %vm107_vm4, %v1226_v57 }
 0x19d   :  { %1237 = vmatpush1.bf16.msra.mxu0 %v2828_v59 }
 0x19e   :  { %2317 = vmatmul.mubr.msk.bf16.vlgmr.msra.gmra.mrb[4].mxu1 %vm103_vm6, %v2315_v58  ;;  %v1519_v39 = vpop.permute.xlu1 %1518  ;;  %v2371_v58 = vld [vmem:[%s2995_s1 + $0x3c] sm:$0xf] }
 0x19f   :  { %v1522_v62 = vsel %vm436_vm5, %v1517_v60, %v1519_v39  ;;  %1565 = vmatprep.mubr.bf16.mxu1 %v2503_v33 }
 0x1a0   :  { %v1521_v63 = vpop.permute.xlu0 %1520  ;;  %2323 = vmatmul.mubr.msk.bf16.vlgmr.msra.gmra.mrb[8].mxu0 %vm103_vm6, %v2321_v61  ;;  %v2842_v2 = vsel %vm107_vm4, %v1522_v62, 0 }
 0x1a1   :  { %v1523_v0 = vsel %vm436_vm5, %v1519_v39, %v1521_v63  ;;  %1343 = vmatprep.mubr.bf16.mxu0 %v2503_v33 }
 0x1a2   :  { %2336 = vmatprep.subr.msk.bf16.mxu1 %vm107_vm4, %v1523_v0  ;;  %v1295_v3 = vpop.permute.xlu1 %1294 }
 0x1a3   :  { %1534 = vmatpush1.bf16.msra.mxu1 %v2842_v2 }
 0x1a4   :  { %v1297_v5 = vpop.permute.xlu0 %1296 }
 0x1a5   :  { %v1300_v7 = vsel %vm178_vm7, %v1295_v3, %v1297_v5 }
 0x1a6   :  { %2337 = vmatmul.mubr.msk.bf16.vlgmr.msra.gmra.mrb[8].mxu1 %vm103_vm6, %v2335_v4  ;;  %v1299_v9 = vpop.permute.xlu1 %1298  ;;  %v2856_v10 = vsel %vm107_vm4, %v1300_v7, 0 }
 0x1a7   :  { %v1301_v1 = vsel %vm178_vm7, %v1297_v5, %v1299_v9  ;;  %1609 = vmatprep.mubr.bf16.mxu1 %v2503_v33 }
 0x1a8   :  { %v1354_v11 = vpop.permute.xlu0 %1353  ;;  %2324 = vmatprep.subr.msk.bf16.mxu0 %vm107_vm4, %v1301_v1  ;;  %2338 = vmatprep.subr.msk.bf16.mxu1 %vm107_vm4, %v1301_v1 }
 0x1a9   :  { %1312 = vmatpush1.bf16.msra.mxu0 %v2856_v10  ;;  %1578 = vmatpush1.bf16.msra.mxu1 %v2856_v10 }
 0x1aa   :  { %v1356_v27 = vpop.permute.xlu1 %1355 }
 0x1ab   :  { %v1359_v15 = vsel %vm239_vm10, %v1354_v11, %v1356_v27 }
 0x1ac   :  { %v1365_v16 = vsel %vm107_vm4, %v1359_v15, 0  ;;  %v1358_v8 = vpop.permute.xlu0 %1357  ;;  %2325 = vmatmul.mubr.msk.bf16.vlgmr.msra.gmra.mrb[8].mxu0 %vm103_vm6, %v1199_v26 }
 0x1ad   :  { %v1360_v13 = vsel %vm239_vm10, %v1356_v27, %v1358_v8  ;;  %1402 = vmatprep.mubr.bf16.mxu0 %v2503_v33 }
 0x1ae   :  { %v1685_v18 = vpop.permute.xlu1 %1684  ;;  %2327 = vmatprep.subr.msk.bf16.mxu0 %vm107_vm4, %v1360_v13  ;;  %2341 = vmatprep.subr.msk.bf16.mxu1 %vm107_vm4, %v1360_v13 }
 0x1af   :  { %1371 = vmatpush1.bf16.msra.mxu0 %v1365_v16 }
 0x1b0   :  { %2330 = vmatprep.subr.msk.bf16.mxu0 %vm107_vm4, %v1423_v53  ;;  %v1687_v19 = vpop.permute.xlu0 %1686 }
 0x1b1   :  { %v1690_v24 = vsel %vm613_vm11, %v1685_v18, %v1687_v19 }
 0x1b2   :  { %2339 = vmatmul.mubr.msk.bf16.vlgmr.msra.gmra.mrb[8].mxu1 %vm103_vm6, %v2334_v17  ;;  %v1689_v20 = vpop.permute.xlu1 %1688  ;;  %v1696_v29 = vsel %vm107_vm4, %v1690_v24, 0 }
 0x1b3   :  { %v1691_v22 = vsel %vm613_vm11, %v1687_v19, %v1689_v20  ;;  %1623 = vmatpush1.bf16.msra.mxu1 %v1365_v16  ;;  %1654 = vmatprep.mubr.bf16.mxu1 %v2503_v33 }
 0x1b4   :  { %2344 = vmatprep.subr.msk.bf16.mxu1 %vm107_vm4, %v1691_v22  ;;  %v1856_v31 = vpop.permute.xlu0 %1855 }
 0x1b6   :  { %v1858_v36 = vpop.permute.xlu1 %1857 }
 0x1b7   :  { %v1861_v42 = vsel %vm788_vm12, %v1856_v31, %v1858_v36 }
 0x1b8   :  { %2328 = vmatmul.mubr.msk.bf16.vlgmr.msra.gmra.mrb[8].mxu0 %vm103_vm6, %v2326_v23  ;;  %v1860_v28 = vpop.permute.xlu0 %1859  ;;  %v1867_v44 = vsel %vm107_vm4, %v1861_v42, 0 }
 0x1b9   :  { %1434 = vmatpush1.bf16.msra.mxu0 %v1428_v14  ;;  %1465 = vmatprep.mubr.bf16.mxu0 %v2503_v33  ;;  %v1862_v37 = vsel %vm788_vm12, %v1858_v36, %v1860_v28 }
 0x1ba   :  { %2350 = vmatprep.subr.msk.bf16.mxu0 %vm107_vm4, %v1226_v57  ;;  %v1935_v40 = vpop.permute.xlu1 %1934  ;;  %v2357_v57 = vld [vmem:[%s2995_s1 + $0x2c] sm:$0xf] }
 0x1bc   :  { %v1937_v41 = vpop.permute.xlu0 %1936 }
 0x1bd   :  { %v1940_v50 = vsel %vm875_vm13, %v1935_v40, %v1937_v41 }
 0x1be   :  { %2342 = vmatmul.mubr.msk.bf16.vlgmr.msra.gmra.mrb[8].mxu1 %vm103_vm6, %v2340_v25  ;;  %v1939_v45 = vpop.permute.xlu1 %1938  ;;  %v1946_v52 = vsel %vm107_vm4, %v1940_v50, 0 }
 0x1bf   :  { %1702 = vmatpush1.bf16.msra.mxu1 %v1696_v29  ;;  %1733 = vmatprep.mubr.bf16.mxu1 %v2503_v33  ;;  %v1941_v30 = vsel %vm875_vm13, %v1937_v41, %v1939_v45 }
 0x1c0   :  { %2364 = vmatprep.subr.msk.bf16.mxu1 %vm107_vm4, %v1523_v0  ;;  %v2171_v46 = vpop.permute.xlu0 %2170 }
 0x1c2   :  { %v2173_v48 = vpop.permute.xlu1 %2172 }
 0x1c3   :  { %v2176_v54 = vsel %vm1122_vm14, %v2171_v46, %v2173_v48 }
 0x1c4   :  { %2331 = vmatmul.mubr.msk.bf16.vlgmr.msra.gmra.mrb[8].mxu0 %vm103_vm6, %v2329_v21  ;;  %v2175_v47 = vpop.permute.xlu0 %2174  ;;  %v2182_v56 = vsel %vm107_vm4, %v2176_v54, 0 }
 0x1c5   :  { %1770 = vmatpush1.bf16.msra.mxu0 %v2828_v59  ;;  %1801 = vmatprep.mubr.bf16.mxu0 %v2503_v33  ;;  %v2177_v49 = vsel %vm1122_vm14, %v2173_v48, %v2175_v47 }
 0x1c6   :  { %2352 = vmatprep.subr.msk.bf16.mxu0 %vm107_vm4, %v1301_v1 }
 0x1ca   :  { %2345 = vmatmul.mubr.msk.bf16.vlgmr.msra.gmra.mrb[8].mxu1 %vm103_vm6, %v2343_v34 }
 0x1cb   :  { %2020 = vmatpush1.bf16.msra.mxu1 %v2842_v2  ;;  %2051 = vmatprep.mubr.bf16.mxu1 %v2503_v33 }
 0x1cc   :  { %2366 = vmatprep.subr.msk.bf16.mxu1 %vm107_vm4, %v1301_v1  ;;  %2351 = vmatmul.mubr.msk.bf16.vlgmr.msra.gmra.mrb[12].mxu0 %vm103_vm6, %v2349_v35 }
 0x1cd   :  { %1814 = vmatpush1.bf16.msra.mxu0 %v2856_v10  ;;  %1845 = vmatprep.mubr.bf16.mxu0 %v2503_v33 }
 0x1ce   :  { %2355 = vmatprep.subr.msk.bf16.mxu0 %vm107_vm4, %v1862_v37 }
 0x1d2   :  { %2365 = vmatmul.mubr.msk.bf16.vlgmr.msra.gmra.mrb[12].mxu1 %vm103_vm6, %v2363_v38 }
 0x1d3   :  { %2064 = vmatpush1.bf16.msra.mxu1 %v2856_v10  ;;  %2095 = vmatprep.mubr.bf16.mxu1 %v2503_v33 }
 0x1d4   :  { %2369 = vmatprep.subr.msk.bf16.mxu1 %vm107_vm4, %v1862_v37 }
 0x1d8   :  { %2353 = vmatmul.mubr.msk.bf16.vlgmr.msra.gmra.mrb[12].mxu0 %vm103_vm6, %v2348_v43 }
 0x1d9   :  { %1873 = vmatpush1.bf16.msra.mxu0 %v1867_v44  ;;  %1904 = vmatprep.mubr.bf16.mxu0 %v2503_v33 }
 0x1da   :  { %2358 = vmatprep.subr.msk.bf16.mxu0 %vm107_vm4, %v1941_v30 }
 0x1de   :  { %2367 = vmatmul.mubr.msk.bf16.vlgmr.msra.gmra.mrb[12].mxu1 %vm103_vm6, %v2362_v32 }
 0x1df   :  { %2109 = vmatpush1.bf16.msra.mxu1 %v1867_v44  ;;  %2140 = vmatprep.mubr.bf16.mxu1 %v2503_v33 }
 0x1e0   :  { %2372 = vmatprep.subr.msk.bf16.mxu1 %vm107_vm4, %v2177_v49 }
 0x1e4   :  { %2356 = vmatmul.mubr.msk.bf16.vlgmr.msra.gmra.mrb[12].mxu0 %vm103_vm6, %v2354_v51 }
 0x1e5   :  { %1952 = vmatpush1.bf16.msra.mxu0 %v1946_v52  ;;  %1983 = vmatprep.mubr.bf16.mxu0 %v2503_v33 }
 0x1ea   :  { %2370 = vmatmul.mubr.msk.bf16.vlgmr.msra.gmra.mrb[12].mxu1 %vm103_vm6, %v2368_v55 }
 0x1eb   :  { %2188 = vmatpush1.bf16.msra.mxu1 %v2182_v56  ;;  %2219 = vmatprep.mubr.bf16.mxu1 %v2503_v33 }
 0x1f0   :  { %2359 = vmatmul.mubr.msk.bf16.vlgmr.msra.gmra.mrb[12].mxu0 %vm103_vm6, %v2357_v57 }
 0x1f6   :  { %2373 = vmatmul.mubr.msk.bf16.vlgmr.msra.gmra.mrb[12].mxu1 %vm103_vm6, %v2371_v58 }
 0x1fe   :  { %v350_v59 = vpop.f32.mrb[0].mxu0 }
 0x1ff   :  { %v352_v60 = vpop.f32.mrb[1].mxu0  ;;  %v372_v61 = vmul.f32 %v350_v59, %v350_v59 }
 0x200   :  { %v2376_v39 = vpack.c.bf16 %v352_v60, %v350_v59  ;;  %v373_v62 = vmul.f32 %v352_v60, %v352_v60  ;;  %v354_v63 = vpop.f32.mrb[2].mxu0  ;;  %v368_v0 = vadd.f32 %v352_v60, %v350_v59 }
 0x201   :  { %v355_v33 = vpop.f32.mrb[3].mxu0 }
 0x202   :  { %367 = vst [vmem:[%s2996_s3] sm:$0xff] %v2376_v39  ;;  %v374_v2 = vadd.f32 %v373_v62, %v372_v61  ;;  %369 = vadd.xlane.f32.xlu1 %v368_v0 }
 0x204   :  { %375 = vadd.xlane.f32.xlu0 %v374_v2  ;;  %v659_v3 = vpop.f32.mrb[0].mxu1 }
 0x205   :  { %v661_v4 = vpop.f32.mrb[1].mxu1  ;;  %v682_v5 = vmul.f32 %v659_v3, %v659_v3 }
 0x206   :  { %v2377_v6 = vpack.c.bf16 %v661_v4, %v659_v3  ;;  %v678_v7 = vadd.f32 %v661_v4, %v659_v3  ;;  %v663_v9 = vpop.f32.mrb[2].mxu1  ;;  %v683_v1 = vmul.f32 %v661_v4, %v661_v4 }
 0x207   :  { %v664_v10 = vpop.f32.mrb[3].mxu1 }
 0x208   :  { %2291 = vst [vmem:[%s2996_s3 + $0x8] sm:$0xff] %v2377_v6  ;;  %679 = vadd.xlane.f32.xlu0 %v678_v7  ;;  %v684_v11 = vadd.f32 %v683_v1, %v682_v5 }
 0x20a   :  { %685 = vadd.xlane.f32.xlu1 %v684_v11 }
 0x267   :  { %v921_v12 = vpop.f32.mrb[4].mxu0 }
 0x268   :  { %v923_v26 = vpop.f32.mrb[5].mxu0  ;;  %v944_v27 = vmul.f32 %v921_v12, %v921_v12 }
 0x269   :  { %v2378_v15 = vpack.c.bf16 %v923_v26, %v921_v12  ;;  %v925_v16 = vpop.f32.mrb[6].mxu0  ;;  %v940_v8 = vadd.f32 %v923_v26, %v921_v12  ;;  %v945_v53 = vmul.f32 %v923_v26, %v923_v26 }
 0x26a   :  { %v926_v13 = vpop.f32.mrb[7].mxu0 }
 0x26b   :  { %2305 = vst [vmem:[%s2996_s3 + $0x10] sm:$0xff] %v2378_v15  ;;  %941 = vadd.xlane.f32.xlu0 %v940_v8  ;;  %v946_v18 = vadd.f32 %v945_v53, %v944_v27 }
 0x26d   :  { %947 = vadd.xlane.f32.xlu1 %v946_v18 }
 0x271   :  { %v1168_v17 = vpop.f32.mrb[4].mxu1 }
 0x272   :  { %v1170_v19 = vpop.f32.mrb[5].mxu1  ;;  %v1191_v20 = vmul.f32 %v1168_v17, %v1168_v17 }
 0x273   :  { %v2379_v22 = vpack.c.bf16 %v1170_v19, %v1168_v17  ;;  %v1172_v23 = vpop.f32.mrb[6].mxu1  ;;  %v1187_v14 = vadd.f32 %v1170_v19, %v1168_v17  ;;  %v1192_v24 = vmul.f32 %v1170_v19, %v1170_v19 }
 0x274   :  { %v1173_v25 = vpop.f32.mrb[7].mxu1 }
 0x275   :  { %2319 = vst [vmem:[%s2996_s3 + $0x18] sm:$0xff] %v2379_v22  ;;  %1188 = vadd.xlane.f32.xlu0 %v1187_v14  ;;  %v1193_v29 = vadd.f32 %v1192_v24, %v1191_v20 }
 0x277   :  { %1194 = vadd.xlane.f32.xlu1 %v1193_v29 }
 0x28f   :  { %v370_v3 = vpop.xlane.xlu1 %369 }
 0x291   :  { %v376_v2 = vpop.xlane.xlu0 %375 }
 0x295   :  { %v680_v4 = vpop.xlane.xlu0 %679 }
 0x296   :  { %v681_v11 = vadd.f32 %v680_v4, %v370_v3 }
 0x297   :  { %v1467_v21 = vpop.f32.mrb[8].mxu0  ;;  %v686_v5 = vpop.xlane.xlu1 %685 }
 0x298   :  { %v1469_v31 = vpop.f32.mrb[9].mxu0  ;;  %v1490_v34 = vmul.f32 %v1467_v21, %v1467_v21  ;;  %v687_v26 = vadd.f32 %v686_v5, %v376_v2 }
 0x299   :  { %v2380_v35 = vpack.c.bf16 %v1469_v31, %v1467_v21  ;;  %v1471_v36 = vpop.f32.mrb[10].mxu0  ;;  %v1486_v28 = vadd.f32 %v1469_v31, %v1467_v21  ;;  %v1491_v37 = vmul.f32 %v1469_v31, %v1469_v31 }
 0x29a   :  { %v1472_v38 = vpop.f32.mrb[11].mxu0 }
 0x29b   :  { %2333 = vst [vmem:[%s2996_s3 + $0x20] sm:$0xff] %v2380_v35  ;;  %1487 = vadd.xlane.f32.xlu0 %v1486_v28  ;;  %v1492_v40 = vadd.f32 %v1491_v37, %v1490_v34 }
 0x29d   :  { %1493 = vadd.xlane.f32.xlu1 %v1492_v40  ;;  %v1735_v41 = vpop.f32.mrb[8].mxu1 }
 0x29e   :  { %v1737_v42 = vpop.f32.mrb[9].mxu1  ;;  %v1758_v43 = vmul.f32 %v1735_v41, %v1735_v41 }
 0x29f   :  { %v2381_v44 = vpack.c.bf16 %v1737_v42, %v1735_v41  ;;  %v1739_v45 = vpop.f32.mrb[10].mxu1  ;;  %v1754_v46 = vadd.f32 %v1737_v42, %v1735_v41  ;;  %v1759_v30 = vmul.f32 %v1737_v42, %v1737_v42 }
 0x2a0   :  { %v1740_v32 = vpop.f32.mrb[11].mxu1 }
 0x2a1   :  { %2347 = vst [vmem:[%s2996_s3 + $0x28] sm:$0xff] %v2381_v44  ;;  %1755 = vadd.xlane.f32.xlu0 %v1754_v46  ;;  %v1760_v47 = vadd.f32 %v1759_v30, %v1758_v43 }
 0x2a3   :  { %1761 = vadd.xlane.f32.xlu1 %v1760_v47 }
 0x2c3   :  { %v1985_v48 = vpop.f32.mrb[12].mxu0 }
 0x2c4   :  { %v1987_v49 = vpop.f32.mrb[13].mxu0  ;;  %v2008_v50 = vmul.f32 %v1985_v48, %v1985_v48 }
 0x2c5   :  { %v2382_v51 = vpack.c.bf16 %v1987_v49, %v1985_v48  ;;  %v1989_v52 = vpop.f32.mrb[14].mxu0  ;;  %v2004_v54 = vadd.f32 %v1987_v49, %v1985_v48  ;;  %v2009_v55 = vmul.f32 %v1987_v49, %v1987_v49 }
 0x2c6   :  { %v1990_v56 = vpop.f32.mrb[15].mxu0 }
 0x2c7   :  { %2361 = vst [vmem:[%s2996_s3 + $0x30] sm:$0xff] %v2382_v51  ;;  %2005 = vadd.xlane.f32.xlu0 %v2004_v54  ;;  %v2010_v57 = vadd.f32 %v2009_v55, %v2008_v50 }
 0x2c9   :  { %2011 = vadd.xlane.f32.xlu1 %v2010_v57  ;;  %v2221_v58 = vpop.f32.mrb[12].mxu1 }
 0x2ca   :  { %v2223_v59 = vpop.f32.mrb[13].mxu1  ;;  %v2244_v60 = vmul.f32 %v2221_v58, %v2221_v58 }
 0x2cb   :  { %v2383_v61 = vpack.c.bf16 %v2223_v59, %v2221_v58  ;;  %v2225_v39 = vpop.f32.mrb[14].mxu1  ;;  %v2240_v62 = vadd.f32 %v2223_v59, %v2221_v58  ;;  %v2245_v63 = vmul.f32 %v2223_v59, %v2223_v59 }
 0x2cc   :  { %v2226_v0 = vpop.f32.mrb[15].mxu1 }
 0x2cd   :  { %2375 = vst [vmem:[%s2996_s3 + $0x38] sm:$0xff] %v2383_v61  ;;  %2241 = vadd.xlane.f32.xlu0 %v2240_v62  ;;  %v2246_v33 = vadd.f32 %v2245_v63, %v2244_v60 }
 0x2cf   :  { %2247 = vadd.xlane.f32.xlu1 %v2246_v33 }
 0x2f8   :  { %v942_v6 = vpop.xlane.xlu0 %941 }
 0x2f9   :  { %v943_v27 = vadd.f32 %v942_v6, %v681_v11 }
 0x2fa   :  { %v948_v7 = vpop.xlane.xlu1 %947 }
 0x2fb   :  { %v949_v16 = vadd.f32 %v948_v7, %v687_v26 }
 0x302   :  { %v1189_v9 = vpop.xlane.xlu0 %1188 }
 0x303   :  { %v1190_v8 = vadd.f32 %v1189_v9, %v943_v27 }
 0x304   :  { %v1195_v1 = vpop.xlane.xlu1 %1194 }
 0x305   :  { %v1196_v13 = vadd.f32 %v1195_v1, %v949_v16 }
 0x328   :  { %v1488_v10 = vpop.xlane.xlu0 %1487 }
 0x329   :  { %v1489_v18 = vadd.f32 %v1488_v10, %v1190_v8 }
 0x32a   :  { %v1494_v12 = vpop.xlane.xlu1 %1493 }
 0x32b   :  { %v1495_v19 = vadd.f32 %v1494_v12, %v1196_v13 }
 0x32e   :  { %v1756_v15 = vpop.xlane.xlu0 %1755 }
 0x32f   :  { %v1757_v20 = vadd.f32 %v1756_v15, %v1489_v18 }
 0x330   :  { %v1762_v53 = vpop.xlane.xlu1 %1761 }
 0x331   :  { %v1763_v23 = vadd.f32 %v1762_v53, %v1495_v19 }
 0x354   :  { %v2006_v17 = vpop.xlane.xlu0 %2005 }
 0x355   :  { %v2007_v14 = vadd.f32 %v2006_v17, %v1757_v20 }
 0x356   :  { %v2012_v22 = vpop.xlane.xlu1 %2011 }
 0x357   :  { %v2013_v25 = vadd.f32 %v2012_v22, %v1763_v23 }
 0x35a   :  { %v2242_v24 = vpop.xlane.xlu0 %2241 }
 0x35b   :  { %v2243_v29 = vadd.f32 %v2242_v24, %v2007_v14 }
 0x35c   :  { %v2248_v21 = vpop.xlane.xlu1 %2247 }
 0x35d   :  { %2251 = vst.msk [vmem:[%s2997_s4] sm:$0xff] %vm2250_vm15, %v2243_v29  ;;  %v2249_v31 = vadd.f32 %v2248_v21, %v2013_v25 }
 0x35f   :  { %2252 = vst.msk [vmem:[%s2998_s5] sm:$0xff] %vm2250_vm15, %v2249_v31 }

</bundles_post_ra>
